<compile_context>
chip_gen: v6e
topology: v6e:2x2x1
jax: 0.10.0
libtpu: 0.0.40
codegen_flags: <defaults>
</compile_context>

<pallas_src>
import jax
import jax.numpy as jnp
from jax.experimental import pallas as pl
from jax.experimental.pallas import tpu as pltpu

# ---------------- tiny synthetic Qwen2 config ----------------
HIDDEN = 32
N_HEADS = 4
N_KV_HEADS = 2
N_REP = N_HEADS // N_KV_HEADS
HEAD_DIM = HIDDEN // N_HEADS          # 8
INTERMEDIATE = 64
VOCAB = 128
N_LAYERS = 2
ROPE_THETA = 10000.0
RMS_EPS = 1e-6

QD = N_HEADS * HEAD_DIM               # 32
KVD = N_KV_HEADS * HEAD_DIM           # 16
QKV_DIM = QD + 2 * KVD                # 64


# ---------------- in-kernel helpers ----------------
def _rmsnorm_f32(x, w):
    var = jnp.mean(x * x, axis=-1, keepdims=True)
    return (x * jax.lax.rsqrt(var + RMS_EPS)) * w


def _swap_halves(x):
    """concat([x[:, half:], x[:, :half]]) -- rotate-half sans sign (the sign is
    folded into the pre-signed sin table)."""
    half = HEAD_DIM // 2
    if HEAD_DIM % 128 == 0:
        # Real head_dim path: one XLU lane-rotate, leaves VALU/vld slots free.
        return pltpu.roll(x, shift=half, axis=-1)
    # Toy D=8: the whole head lives inside one vreg, so an in-vreg half swap
    # is cheap and avoids the sub-128 lane-rotate path.
    return jnp.concatenate([x[:, half:], x[:, :half]], axis=-1)


# ---------------- Pallas kernels ----------------
def _qkv_attn_kernel(h_ref, ln1_ref, wqkv_ref, bqkv_ref, cos_ref, sin_ref,
                     bias_ref, o_ref):
    # h_ref:    [S, H]    bf16  residual-stream rows for one batch
    # ln1_ref:  [1, H]    f32
    # wqkv_ref: [H, QKV]  bf16  (q columns pre-scaled by 1/sqrt(D))
    # bqkv_ref: [1, QKV]  f32   (q bias pre-scaled by 1/sqrt(D))
    # cos_ref:  [S, D]    f32
    # sin_ref:  [S, D]    f32   (pre-signed: first half negated)
    # bias_ref: [1, S, S] f32   additive causal+padding bias for this batch
    # o_ref:    [S, NH*D] bf16  attention output slab, head-major columns
    S = h_ref.shape[0]

    x = h_ref[...].astype(jnp.float32)
    xn = _rmsnorm_f32(x, ln1_ref[...])
    qkv = jnp.dot(xn.astype(jnp.bfloat16), wqkv_ref[...],
                  preferred_element_type=jnp.float32) + bqkv_ref[...]

    cos = cos_ref[...]
    sin = sin_ref[...]
    bias = bias_ref[0]                       # [S, S]
    bias_rep = jnp.concatenate([bias] * N_REP, axis=0)   # rows = (rep, pos)

    def rope(v):                             # v: [S, D], f32
        return v * cos + _swap_halves(v) * sin

    out_cols = []
    for g in range(N_KV_HEADS):
        kc = QD + g * HEAD_DIM
        vc = QD + KVD + g * HEAD_DIM
        k = rope(qkv[:, kc:kc + HEAD_DIM]).astype(jnp.bfloat16)   # [S, D]
        v = qkv[:, vc:vc + HEAD_DIM].astype(jnp.bfloat16)         # [S, D]

        # All N_REP query heads that share this KV head: one [N_REP*S, D]
        # slab -> single score matmul (better MXU fill, K/V reused in VMEM).
        q_rows = [rope(qkv[:, (g * N_REP + r) * HEAD_DIM:
                             (g * N_REP + r + 1) * HEAD_DIM])
                  for r in range(N_REP)]
        qg = jnp.concatenate(q_rows, axis=0).astype(jnp.bfloat16)  # [N_REP*S, D]

        s = jax.lax.dot_general(qg, k, (((1,), (1,)), ((), ())),
                                preferred_element_type=jnp.float32)  # [N_REP*S, S]
        s = s + bias_rep
        s = s - jnp.max(s, axis=-1, keepdims=True)
        p = jnp.exp(s)
        p = p * pl.reciprocal(jnp.sum(p, axis=-1, keepdims=True), approx=True)

        og = jnp.dot(p.astype(jnp.bfloat16), v,
                     preferred_element_type=jnp.float32)             # [N_REP*S, D]
        out_cols += [og[r * S:(r + 1) * S] for r in range(N_REP)]

    # Single lane-dense [S, NH*D] store (head-major columns, o_proj-ready).
    o_ref[...] = jnp.concatenate(out_cols, axis=1).astype(o_ref.dtype)


def _attn_out_mlp_kernel(attn_ref, res_ref, ow_ref, ln2_ref, wgu_ref, wd_ref,
                         o_ref):
    # attn: [TM, NH*D] bf16; res: [TM, H] bf16; weights bf16; ln2 f32.
    h = res_ref[...].astype(jnp.float32) + jnp.dot(
        attn_ref[...], ow_ref[...], preferred_element_type=jnp.float32)
    xn = _rmsnorm_f32(h, ln2_ref[...])
    gu = jnp.dot(xn.astype(jnp.bfloat16), wgu_ref[...],
                 preferred_element_type=jnp.float32)      # [TM, 2*I] lane-dense
    g = gu[:, :INTERMEDIATE]
    u = gu[:, INTERMEDIATE:]
    act = g * jax.nn.sigmoid(g) * u                       # SwiGLU, f32 (EUP)
    o_ref[...] = (h + jnp.dot(act.astype(jnp.bfloat16), wd_ref[...],
                              preferred_element_type=jnp.float32)
                  ).astype(o_ref.dtype)


def _final_head_kernel(h_ref, lnw_ref, w_ref, o_ref):
    xn = _rmsnorm_f32(h_ref[...].astype(jnp.float32), lnw_ref[...])
    o_ref[...] = jnp.dot(xn.astype(jnp.bfloat16), w_ref[...],
                         preferred_element_type=jnp.float32)


# ---------------- pallas_call wrappers ----------------
def _layer_attention(hidden, lp, cos, sin_signed, bias, B, S):
    BS, H = hidden.shape
    return pl.pallas_call(
        _qkv_attn_kernel,
        out_shape=jax.ShapeDtypeStruct((BS, QD), jnp.bfloat16),
        grid=(B,),
        in_specs=[
            pl.BlockSpec((S, H), lambda b: (b, 0)),
            pl.BlockSpec((1, H), lambda b: (0, 0)),
            pl.BlockSpec((H, QKV_DIM), lambda b: (0, 0)),
            pl.BlockSpec((1, QKV_DIM), lambda b: (0, 0)),
            pl.BlockSpec((S, HEAD_DIM), lambda b: (0, 0)),
            pl.BlockSpec((S, HEAD_DIM), lambda b: (0, 0)),
            pl.BlockSpec((1, S, S), lambda b: (b, 0, 0)),
        ],
        out_specs=pl.BlockSpec((S, QD), lambda b: (b, 0)),
        compiler_params=pltpu.CompilerParams(
            dimension_semantics=("parallel",)),
    )(hidden, lp["ln1_w"], lp["qkv_w"], lp["qkv_b"], cos, sin_signed, bias)


def _layer_out_mlp(attn, hidden, lp, tm):
    BS, H = hidden.shape
    return pl.pallas_call(
        _attn_out_mlp_kernel,
        out_shape=jax.ShapeDtypeStruct((BS, H), jnp.bfloat16),
        grid=(BS // tm,),
        in_specs=[
            pl.BlockSpec((tm, QD), lambda m: (m, 0)),
            pl.BlockSpec((tm, H), lambda m: (m, 0)),
            pl.BlockSpec((QD, H), lambda m: (0, 0)),
            pl.BlockSpec((1, H), lambda m: (0, 0)),
            pl.BlockSpec((H, 2 * INTERMEDIATE), lambda m: (0, 0)),
            pl.BlockSpec((INTERMEDIATE, H), lambda m: (0, 0)),
        ],
        out_specs=pl.BlockSpec((tm, H), lambda m: (m, 0)),
        compiler_params=pltpu.CompilerParams(
            dimension_semantics=("parallel",)),
    )(attn, hidden, lp["o_w"], lp["ln2_w"], lp["gateup_w"], lp["down_w"])


def _lm_head(hidden, lnw, w, tm):
    BS, H = hidden.shape
    V = w.shape[1]
    # TODO(synk): for autoregressive decode, slice `hidden` to the last token
    # here and/or tile the vocab axis ("parallel" N grid) at real vocab size.
    return pl.pallas_call(
        _final_head_kernel,
        out_shape=jax.ShapeDtypeStruct((BS, V), jnp.float32),
        grid=(BS // tm,),
        in_specs=[
            pl.BlockSpec((tm, H), lambda m: (m, 0)),
            pl.BlockSpec((1, H), lambda m: (0, 0)),
            pl.BlockSpec((H, V), lambda m: (0, 0)),
        ],
        out_specs=pl.BlockSpec((tm, V), lambda m: (m, 0)),
        compiler_params=pltpu.CompilerParams(
            dimension_semantics=("parallel",)),
    )(hidden, lnw, w)


# ---------------- parameter init (deterministic, synthetic) ----------------
def init_params(key):
    def w(k, shape):
        return jax.random.normal(k, shape, jnp.float32) * 0.02

    q_scale = 1.0 / (HEAD_DIM ** 0.5)
    layers = []
    for _ in range(N_LAYERS):
        key, *ks = jax.random.split(key, 11)
        ks = iter(ks)
        q_w = w(next(ks), (HIDDEN, QD))
        q_b = w(next(ks), (1, QD))
        k_w = w(next(ks), (HIDDEN, KVD))
        k_b = w(next(ks), (1, KVD))
        v_w = w(next(ks), (HIDDEN, KVD))
        v_b = w(next(ks), (1, KVD))
        o_w = w(next(ks), (QD, HIDDEN))
        gate_w = w(next(ks), (HIDDEN, INTERMEDIATE))
        up_w = w(next(ks), (HIDDEN, INTERMEDIATE))
        down_w = w(next(ks), (INTERMEDIATE, HIDDEN))

        # Fuse QKV (fold 1/sqrt(D) into q weight+bias); fuse gate/up columns.
        qkv_w = jnp.concatenate([q_w * q_scale, k_w, v_w], axis=1)
        qkv_b = jnp.concatenate([q_b * q_scale, k_b, v_b], axis=1)
        gateup_w = jnp.concatenate([gate_w, up_w], axis=1)

        layers.append(dict(
            ln1_w=jnp.ones((1, HIDDEN), jnp.float32),
            qkv_w=qkv_w.astype(jnp.bfloat16),
            qkv_b=qkv_b,                                  # f32 bias
            o_w=o_w.astype(jnp.bfloat16),
            ln2_w=jnp.ones((1, HIDDEN), jnp.float32),
            gateup_w=gateup_w.astype(jnp.bfloat16),
            down_w=down_w.astype(jnp.bfloat16),
        ))
    key, k_lm = jax.random.split(key)
    return dict(
        layers=layers,
        final_ln_w=jnp.ones((1, HIDDEN), jnp.float32),
        lm_head_w=w(k_lm, (HIDDEN, VOCAB)).astype(jnp.bfloat16),
    )


# ---------------- forward: TextDecoder.forward(embedding, attention_mask) ----
def text_decoder_forward(params, embedding, attention_mask=None):
    B, S, H = embedding.shape
    if attention_mask is None:
        attention_mask = jnp.ones((B, S), jnp.int32)

    # RoPE tables [S, D]; sin is pre-signed so rotate-half becomes a pure
    # half-swap/lane-rotate inside the kernel.
    half = HEAD_DIM // 2
    inv_freq = 1.0 / (ROPE_THETA ** (
        jnp.arange(0, HEAD_DIM, 2, dtype=jnp.float32) / HEAD_DIM))
    pos = jnp.arange(S, dtype=jnp.float32)
    freqs = pos[:, None] * inv_freq[None, :]
    emb = jnp.concatenate([freqs, freqs], axis=-1)
    cos = jnp.cos(emb)
    sign = jnp.concatenate([-jnp.ones((half,), jnp.float32),
                            jnp.ones((half,), jnp.float32)])
    sin_signed = jnp.sin(emb) * sign[None, :]

    # Additive causal + padding bias, built once: [B, S, S] f32 (scores stay
    # f32 in-kernel, so -1e9 is a safe mask value).
    row = jnp.arange(S)[:, None]
    col = jnp.arange(S)[None, :]
    allowed = (row >= col)[None, :, :] & (attention_mask[:, None, :] > 0)
    bias = jnp.where(allowed, 0.0, -1e9).astype(jnp.float32)

    # Residual stream kept bf16 between kernels (f32 stats/accum in-kernel).
    hidden = embedding.astype(jnp.bfloat16).reshape(B * S, H)

    tm = S                       # row tile for the matmul kernels (toy size);
                                 # 256-512 rows at real sizes per generation.
    for lp in params["layers"]:
        # RMSNorm + QKV + RoPE + GQA attention, grid=(B,), lane-dense output.
        attn = _layer_attention(hidden, lp, cos, sin_signed, bias, B, S)
        # o_proj + residual + RMSNorm + gate/up + SwiGLU + down + residual.
        hidden = _layer_out_mlp(attn, hidden, lp, tm)

    logits = _lm_head(hidden, params["final_ln_w"], params["lm_head_w"], tm)
    return logits.reshape(B, S, VOCAB)   # == model_output.logits


if __name__ == "__main__":
    key = jax.random.PRNGKey(0)
    pkey, ekey = jax.random.split(key)
    params = init_params(pkey)

    B, S = 2, 16
    embedding = jax.random.normal(ekey, (B, S, HIDDEN), jnp.float32)
    attention_mask = jnp.array([[1] * S, [1] * (S - 2) + [0] * 2],
                               dtype=jnp.int32)

    logits = jax.jit(text_decoder_forward)(params, embedding, attention_mask)
    jax.block_until_ready(logits)

    assert logits.shape == (B, S, VOCAB)
    assert bool(jnp.all(jnp.isfinite(logits)))
    print("KERNEL_OK")
</pallas_src>

<mosaic_0001>
module attributes {stable_mosaic.version = 11 : i64} {
  func.func @_final_head_kernel(%arg0: i32, %arg1: memref<16x32xbf16, #tpu.memory_space<vmem>>, %arg2: memref<1x32xf32, #tpu.memory_space<vmem>>, %arg3: memref<32x128xbf16, #tpu.memory_space<vmem>>, %arg4: memref<16x128xf32, #tpu.memory_space<vmem>>) attributes {dimension_semantics = [#tpu.dimension_semantics<parallel>], iteration_bounds = array<i64: 2>, scalar_prefetch = 0 : i64, scratch_operands = 0 : i64, tpu.core_type = #tpu.core_type<tc>, window_params = [{transform_indices = @transform_0, window_bounds = array<i64: 16, 32>}, {pipeline_mode = #tpu.pipeline_mode<synchronous>, transform_indices = @transform_1, window_bounds = array<i64: 1, 32>}, {pipeline_mode = #tpu.pipeline_mode<synchronous>, transform_indices = @transform_2, window_bounds = array<i64: 32, 128>}, {transform_indices = @transform_3, window_bounds = array<i64: 16, 128>}]} {
    %c0 = arith.constant 0 : index
    %c0_0 = arith.constant 0 : index
    %0 = vector.load %arg1[%c0, %c0_0] : memref<16x32xbf16, #tpu.memory_space<vmem>>, vector<16x32xbf16>
    %1 = arith.extf %0 : vector<16x32xbf16> to vector<16x32xf32>
    %c0_1 = arith.constant 0 : index
    %c0_2 = arith.constant 0 : index
    %2 = vector.load %arg2[%c0_1, %c0_2] : memref<1x32xf32, #tpu.memory_space<vmem>>, vector<1x32xf32>
    %3 = arith.mulf %1, %1 : vector<16x32xf32>
    %cst = arith.constant dense<0.000000e+00> : vector<16xf32>
    %4 = vector.multi_reduction <add>, %3, %cst [1] : vector<16x32xf32> to vector<16xf32>
    %5 = vector.shape_cast %4 : vector<16xf32> to vector<16x1xf32>
    %cst_3 = arith.constant 3.200000e+01 : f32
    %6 = vector.broadcast %cst_3 : f32 to vector<16x1xf32>
    %7 = arith.divf %5, %6 : vector<16x1xf32>
    %cst_4 = arith.constant 9.99999997E-7 : f32
    %8 = vector.broadcast %cst_4 : f32 to vector<16x1xf32>
    %9 = arith.addf %7, %8 : vector<16x1xf32>
    %10 = math.rsqrt %9 : vector<16x1xf32>
    %11 = vector.broadcast %10 : vector<16x1xf32> to vector<16x32xf32>
    %12 = arith.mulf %1, %11 : vector<16x32xf32>
    %13 = vector.broadcast %2 : vector<1x32xf32> to vector<16x32xf32>
    %14 = arith.mulf %12, %13 : vector<16x32xf32>
    %15 = arith.truncf %14 : vector<16x32xf32> to vector<16x32xbf16>
    %c0_5 = arith.constant 0 : index
    %c0_6 = arith.constant 0 : index
    %16 = vector.load %arg3[%c0_5, %c0_6] : memref<32x128xbf16, #tpu.memory_space<vmem>>, vector<32x128xbf16>
    %cst_7 = arith.constant dense<0.000000e+00> : vector<16x128xf32>
    %17 = tpu.matmul %15, %16, %cst_7 {dimension_numbers = #tpu.dot_dimension_numbers<[1], [0], [0], [1], [0, 0, 1, 1], [], []>} : vector<16x32xbf16>, vector<32x128xbf16>, vector<16x128xf32> -> vector<16x128xf32>
    %c0_8 = arith.constant 0 : index
    %c0_9 = arith.constant 0 : index
    %18 = vector.load %arg4[%c0_8, %c0_9] : memref<16x128xf32, #tpu.memory_space<vmem>>, vector<16x128xf32>
    tpu.vector_store %arg4[%c0_8, %c0_9], %17 {strides = array<i32>} : memref<16x128xf32, #tpu.memory_space<vmem>>, vector<16x128xf32>,
    return
  }
  func.func @transform_0(%arg0: i32) -> (i32, i32) {
    %c0_i32 = arith.constant 0 : i32
    %c0_i32_0 = arith.constant 0 : i32
    return %arg0, %c0_i32 : i32, i32
  }
  func.func @transform_1(%arg0: i32) -> (i32, i32) {
    %c0_i32 = arith.constant 0 : i32
    %c0_i32_0 = arith.constant 0 : i32
    %c0_i32_1 = arith.constant 0 : i32
    return %c0_i32, %c0_i32_0 : i32, i32
  }
  func.func @transform_2(%arg0: i32) -> (i32, i32) {
    %c0_i32 = arith.constant 0 : i32
    %c0_i32_0 = arith.constant 0 : i32
    %c0_i32_1 = arith.constant 0 : i32
    return %c0_i32, %c0_i32_0 : i32, i32
  }
  func.func @transform_3(%arg0: i32) -> (i32, i32) {
    %c0_i32 = arith.constant 0 : i32
    %c0_i32_0 = arith.constant 0 : i32
    return %arg0, %c0_i32 : i32, i32
  }
}

module attributes {stable_mosaic.version = 11 : i64} {
  func.func @_qkv_attn_kernel(%arg0: i32, %arg1: memref<16x32xbf16, #tpu.memory_space<vmem>>, %arg2: memref<1x32xf32, #tpu.memory_space<vmem>>, %arg3: memref<32x64xbf16, #tpu.memory_space<vmem>>, %arg4: memref<1x64xf32, #tpu.memory_space<vmem>>, %arg5: memref<16x8xf32, #tpu.memory_space<vmem>>, %arg6: memref<16x8xf32, #tpu.memory_space<vmem>>, %arg7: memref<1x16x16xf32, #tpu.memory_space<vmem>>, %arg8: memref<16x32xbf16, #tpu.memory_space<vmem>>) attributes {dimension_semantics = [#tpu.dimension_semantics<parallel>], iteration_bounds = array<i64: 2>, scalar_prefetch = 0 : i64, scratch_operands = 0 : i64, tpu.core_type = #tpu.core_type<tc>, window_params = [{transform_indices = @transform_0, window_bounds = array<i64: 16, 32>}, {pipeline_mode = #tpu.pipeline_mode<synchronous>, transform_indices = @transform_1, window_bounds = array<i64: 1, 32>}, {pipeline_mode = #tpu.pipeline_mode<synchronous>, transform_indices = @transform_2, window_bounds = array<i64: 32, 64>}, {pipeline_mode = #tpu.pipeline_mode<synchronous>, transform_indices = @transform_3, window_bounds = array<i64: 1, 64>}, {pipeline_mode = #tpu.pipeline_mode<synchronous>, transform_indices = @transform_4, window_bounds = array<i64: 16, 8>}, {pipeline_mode = #tpu.pipeline_mode<synchronous>, transform_indices = @transform_5, window_bounds = array<i64: 16, 8>}, {transform_indices = @transform_6, window_bounds = array<i64: 1, 16, 16>}, {transform_indices = @transform_7, window_bounds = array<i64: 16, 32>}]} {
    %c0 = arith.constant 0 : index
    %c0_0 = arith.constant 0 : index
    %0 = vector.load %arg1[%c0, %c0_0] : memref<16x32xbf16, #tpu.memory_space<vmem>>, vector<16x32xbf16>
    %1 = arith.extf %0 : vector<16x32xbf16> to vector<16x32xf32>
    %c0_1 = arith.constant 0 : index
    %c0_2 = arith.constant 0 : index
    %2 = vector.load %arg2[%c0_1, %c0_2] : memref<1x32xf32, #tpu.memory_space<vmem>>, vector<1x32xf32>
    %3 = arith.mulf %1, %1 : vector<16x32xf32>
    %cst = arith.constant dense<0.000000e+00> : vector<16xf32>
    %4 = vector.multi_reduction <add>, %3, %cst [1] : vector<16x32xf32> to vector<16xf32>
    %5 = vector.shape_cast %4 : vector<16xf32> to vector<16x1xf32>
    %cst_3 = arith.constant 3.200000e+01 : f32
    %6 = vector.broadcast %cst_3 : f32 to vector<16x1xf32>
    %7 = arith.divf %5, %6 : vector<16x1xf32>
    %cst_4 = arith.constant 9.99999997E-7 : f32
    %8 = vector.broadcast %cst_4 : f32 to vector<16x1xf32>
    %9 = arith.addf %7, %8 : vector<16x1xf32>
    %10 = math.rsqrt %9 : vector<16x1xf32>
    %11 = vector.broadcast %10 : vector<16x1xf32> to vector<16x32xf32>
    %12 = arith.mulf %1, %11 : vector<16x32xf32>
    %13 = vector.broadcast %2 : vector<1x32xf32> to vector<16x32xf32>
    %14 = arith.mulf %12, %13 : vector<16x32xf32>
    %15 = arith.truncf %14 : vector<16x32xf32> to vector<16x32xbf16>
    %c0_5 = arith.constant 0 : index
    %c0_6 = arith.constant 0 : index
    %16 = vector.load %arg3[%c0_5, %c0_6] : memref<32x64xbf16, #tpu.memory_space<vmem>>, vector<32x64xbf16>
    %cst_7 = arith.constant dense<0.000000e+00> : vector<16x64xf32>
    %17 = tpu.matmul %15, %16, %cst_7 {dimension_numbers = #tpu.dot_dimension_numbers<[1], [0], [0], [1], [0, 0, 1, 1], [], []>} : vector<16x32xbf16>, vector<32x64xbf16>, vector<16x64xf32> -> vector<16x64xf32>
    %c0_8 = arith.constant 0 : index
    %c0_9 = arith.constant 0 : index
    %18 = vector.load %arg4[%c0_8, %c0_9] : memref<1x64xf32, #tpu.memory_space<vmem>>, vector<1x64xf32>
    %19 = vector.broadcast %18 : vector<1x64xf32> to vector<16x64xf32>
    %20 = arith.addf %17, %19 : vector<16x64xf32>
    %c0_10 = arith.constant 0 : index
    %c0_11 = arith.constant 0 : index
    %21 = vector.load %arg5[%c0_10, %c0_11] : memref<16x8xf32, #tpu.memory_space<vmem>>, vector<16x8xf32>
    %c0_12 = arith.constant 0 : index
    %c0_13 = arith.constant 0 : index
    %22 = vector.load %arg6[%c0_12, %c0_13] : memref<16x8xf32, #tpu.memory_space<vmem>>, vector<16x8xf32>
    %c0_14 = arith.constant 0 : index
    %c0_15 = arith.constant 0 : index
    %c0_16 = arith.constant 0 : index
    %23 = vector.load %arg7[%c0_14, %c0_15, %c0_16] : memref<1x16x16xf32, #tpu.memory_space<vmem>>, vector<1x16x16xf32>
    %24 = vector.shape_cast %23 : vector<1x16x16xf32> to vector<16x16xf32>
    %25 = tpu.concatenate %24, %24 in 0 : vector<16x16xf32>, vector<16x16xf32> -> vector<32x16xf32>
    %26 = vector.extract_strided_slice %20 {offsets = [0, 32], sizes = [16, 8], strides = [1, 1]} : vector<16x64xf32> to vector<16x8xf32>
    %27 = arith.mulf %26, %21 : vector<16x8xf32>
    %28 = vector.extract_strided_slice %26 {offsets = [0, 4], sizes = [16, 4], strides = [1, 1]} : vector<16x8xf32> to vector<16x4xf32>
    %29 = vector.extract_strided_slice %26 {offsets = [0, 0], sizes = [16, 4], strides = [1, 1]} : vector<16x8xf32> to vector<16x4xf32>
    %30 = tpu.concatenate %28, %29 in 1 : vector<16x4xf32>, vector<16x4xf32> -> vector<16x8xf32>
    %31 = arith.mulf %30, %22 : vector<16x8xf32>
    %32 = arith.addf %27, %31 : vector<16x8xf32>
    %33 = arith.truncf %32 : vector<16x8xf32> to vector<16x8xbf16>
    %34 = vector.extract_strided_slice %20 {offsets = [0, 48], sizes = [16, 8], strides = [1, 1]} : vector<16x64xf32> to vector<16x8xf32>
    %35 = arith.truncf %34 : vector<16x8xf32> to vector<16x8xbf16>
    %36 = vector.extract_strided_slice %20 {offsets = [0, 0], sizes = [16, 8], strides = [1, 1]} : vector<16x64xf32> to vector<16x8xf32>
    %37 = arith.mulf %36, %21 : vector<16x8xf32>
    %38 = vector.extract_strided_slice %36 {offsets = [0, 4], sizes = [16, 4], strides = [1, 1]} : vector<16x8xf32> to vector<16x4xf32>
    %39 = vector.extract_strided_slice %36 {offsets = [0, 0], sizes = [16, 4], strides = [1, 1]} : vector<16x8xf32> to vector<16x4xf32>
    %40 = tpu.concatenate %38, %39 in 1 : vector<16x4xf32>, vector<16x4xf32> -> vector<16x8xf32>
    %41 = arith.mulf %40, %22 : vector<16x8xf32>
    %42 = arith.addf %37, %41 : vector<16x8xf32>
    %43 = vector.extract_strided_slice %20 {offsets = [0, 8], sizes = [16, 8], strides = [1, 1]} : vector<16x64xf32> to vector<16x8xf32>
    %44 = arith.mulf %43, %21 : vector<16x8xf32>
    %45 = vector.extract_strided_slice %43 {offsets = [0, 4], sizes = [16, 4], strides = [1, 1]} : vector<16x8xf32> to vector<16x4xf32>
    %46 = vector.extract_strided_slice %43 {offsets = [0, 0], sizes = [16, 4], strides = [1, 1]} : vector<16x8xf32> to vector<16x4xf32>
    %47 = tpu.concatenate %45, %46 in 1 : vector<16x4xf32>, vector<16x4xf32> -> vector<16x8xf32>
    %48 = arith.mulf %47, %22 : vector<16x8xf32>
    %49 = arith.addf %44, %48 : vector<16x8xf32>
    %50 = tpu.concatenate %42, %49 in 0 : vector<16x8xf32>, vector<16x8xf32> -> vector<32x8xf32>
    %51 = arith.truncf %50 : vector<32x8xf32> to vector<32x8xbf16>
    %cst_17 = arith.constant dense<0.000000e+00> : vector<32x16xf32>
    %52 = tpu.matmul %51, %33, %cst_17 {dimension_numbers = #tpu.dot_dimension_numbers<[1], [1], [0], [0], [0, 0, 1, 0], [], []>} : vector<32x8xbf16>, vector<16x8xbf16>, vector<32x16xf32> -> vector<32x16xf32>
    %53 = arith.addf %52, %25 : vector<32x16xf32>
    %cst_18 = arith.constant dense<0xFF800000> : vector<32xf32>
    %54 = vector.multi_reduction <maximumf>, %53, %cst_18 [1] : vector<32x16xf32> to vector<32xf32>
    %55 = vector.shape_cast %54 : vector<32xf32> to vector<32x1xf32>
    %56 = vector.broadcast %55 : vector<32x1xf32> to vector<32x16xf32>
    %57 = arith.subf %53, %56 : vector<32x16xf32>
    %58 = math.exp %57 : vector<32x16xf32>
    %cst_19 = arith.constant dense<0.000000e+00> : vector<32xf32>
    %59 = vector.multi_reduction <add>, %58, %cst_19 [1] : vector<32x16xf32> to vector<32xf32>
    %60 = vector.shape_cast %59 : vector<32xf32> to vector<32x1xf32>
    %61 = tpu.reciprocal %60 {approx = true} : vector<32x1xf32> -> vector<32x1xf32>
    %62 = vector.broadcast %61 : vector<32x1xf32> to vector<32x16xf32>
    %63 = arith.mulf %58, %62 : vector<32x16xf32>
    %64 = arith.truncf %63 : vector<32x16xf32> to vector<32x16xbf16>
    %cst_20 = arith.constant dense<0.000000e+00> : vector<32x8xf32>
    %65 = tpu.matmul %64, %35, %cst_20 {dimension_numbers = #tpu.dot_dimension_numbers<[1], [0], [0], [1], [0, 0, 1, 1], [], []>} : vector<32x16xbf16>, vector<16x8xbf16>, vector<32x8xf32> -> vector<32x8xf32>
    %66 = vector.extract_strided_slice %65 {offsets = [0, 0], sizes = [16, 8], strides = [1, 1]} : vector<32x8xf32> to vector<16x8xf32>
    %67 = vector.extract_strided_slice %65 {offsets = [16, 0], sizes = [16, 8], strides = [1, 1]} : vector<32x8xf32> to vector<16x8xf32>
    %68 = vector.extract_strided_slice %20 {offsets = [0, 40], sizes = [16, 8], strides = [1, 1]} : vector<16x64xf32> to vector<16x8xf32>
    %69 = arith.mulf %68, %21 : vector<16x8xf32>
    %70 = vector.extract_strided_slice %68 {offsets = [0, 4], sizes = [16, 4], strides = [1, 1]} : vector<16x8xf32> to vector<16x4xf32>
    %71 = vector.extract_strided_slice %68 {offsets = [0, 0], sizes = [16, 4], strides = [1, 1]} : vector<16x8xf32> to vector<16x4xf32>
    %72 = tpu.concatenate %70, %71 in 1 : vector<16x4xf32>, vector<16x4xf32> -> vector<16x8xf32>
    %73 = arith.mulf %72, %22 : vector<16x8xf32>
    %74 = arith.addf %69, %73 : vector<16x8xf32>
    %75 = arith.truncf %74 : vector<16x8xf32> to vector<16x8xbf16>
    %76 = vector.extract_strided_slice %20 {offsets = [0, 56], sizes = [16, 8], strides = [1, 1]} : vector<16x64xf32> to vector<16x8xf32>
    %77 = arith.truncf %76 : vector<16x8xf32> to vector<16x8xbf16>
    %78 = vector.extract_strided_slice %20 {offsets = [0, 16], sizes = [16, 8], strides = [1, 1]} : vector<16x64xf32> to vector<16x8xf32>
    %79 = arith.mulf %78, %21 : vector<16x8xf32>
    %80 = vector.extract_strided_slice %78 {offsets = [0, 4], sizes = [16, 4], strides = [1, 1]} : vector<16x8xf32> to vector<16x4xf32>
    %81 = vector.extract_strided_slice %78 {offsets = [0, 0], sizes = [16, 4], strides = [1, 1]} : vector<16x8xf32> to vector<16x4xf32>
    %82 = tpu.concatenate %80, %81 in 1 : vector<16x4xf32>, vector<16x4xf32> -> vector<16x8xf32>
    %83 = arith.mulf %82, %22 : vector<16x8xf32>
    %84 = arith.addf %79, %83 : vector<16x8xf32>
    %85 = vector.extract_strided_slice %20 {offsets = [0, 24], sizes = [16, 8], strides = [1, 1]} : vector<16x64xf32> to vector<16x8xf32>
    %86 = arith.mulf %85, %21 : vector<16x8xf32>
    %87 = vector.extract_strided_slice %85 {offsets = [0, 4], sizes = [16, 4], strides = [1, 1]} : vector<16x8xf32> to vector<16x4xf32>
    %88 = vector.extract_strided_slice %85 {offsets = [0, 0], sizes = [16, 4], strides = [1, 1]} : vector<16x8xf32> to vector<16x4xf32>
    %89 = tpu.concatenate %87, %88 in 1 : vector<16x4xf32>, vector<16x4xf32> -> vector<16x8xf32>
    %90 = arith.mulf %89, %22 : vector<16x8xf32>
    %91 = arith.addf %86, %90 : vector<16x8xf32>
    %92 = tpu.concatenate %84, %91 in 0 : vector<16x8xf32>, vector<16x8xf32> -> vector<32x8xf32>
    %93 = arith.truncf %92 : vector<32x8xf32> to vector<32x8xbf16>
    %cst_21 = arith.constant dense<0.000000e+00> : vector<32x16xf32>
    %94 = tpu.matmul %93, %75, %cst_21 {dimension_numbers = #tpu.dot_dimension_numbers<[1], [1], [0], [0], [0, 0, 1, 0], [], []>} : vector<32x8xbf16>, vector<16x8xbf16>, vector<32x16xf32> -> vector<32x16xf32>
    %95 = arith.addf %94, %25 : vector<32x16xf32>
    %cst_22 = arith.constant dense<0xFF800000> : vector<32xf32>
    %96 = vector.multi_reduction <maximumf>, %95, %cst_22 [1] : vector<32x16xf32> to vector<32xf32>
    %97 = vector.shape_cast %96 : vector<32xf32> to vector<32x1xf32>
    %98 = vector.broadcast %97 : vector<32x1xf32> to vector<32x16xf32>
    %99 = arith.subf %95, %98 : vector<32x16xf32>
    %100 = math.exp %99 : vector<32x16xf32>
    %cst_23 = arith.constant dense<0.000000e+00> : vector<32xf32>
    %101 = vector.multi_reduction <add>, %100, %cst_23 [1] : vector<32x16xf32> to vector<32xf32>
    %102 = vector.shape_cast %101 : vector<32xf32> to vector<32x1xf32>
    %103 = tpu.reciprocal %102 {approx = true} : vector<32x1xf32> -> vector<32x1xf32>
    %104 = vector.broadcast %103 : vector<32x1xf32> to vector<32x16xf32>
    %105 = arith.mulf %100, %104 : vector<32x16xf32>
    %106 = arith.truncf %105 : vector<32x16xf32> to vector<32x16xbf16>
    %cst_24 = arith.constant dense<0.000000e+00> : vector<32x8xf32>
    %107 = tpu.matmul %106, %77, %cst_24 {dimension_numbers = #tpu.dot_dimension_numbers<[1], [0], [0], [1], [0, 0, 1, 1], [], []>} : vector<32x16xbf16>, vector<16x8xbf16>, vector<32x8xf32> -> vector<32x8xf32>
    %108 = vector.extract_strided_slice %107 {offsets = [0, 0], sizes = [16, 8], strides = [1, 1]} : vector<32x8xf32> to vector<16x8xf32>
    %109 = vector.extract_strided_slice %107 {offsets = [16, 0], sizes = [16, 8], strides = [1, 1]} : vector<32x8xf32> to vector<16x8xf32>
    %110 = tpu.concatenate %66, %67, %108, %109 in 1 : vector<16x8xf32>, vector<16x8xf32>, vector<16x8xf32>, vector<16x8xf32> -> vector<16x32xf32>
    %111 = arith.truncf %110 : vector<16x32xf32> to vector<16x32xbf16>
    %c0_25 = arith.constant 0 : index
    %c0_26 = arith.constant 0 : index
    %112 = vector.load %arg8[%c0_25, %c0_26] : memref<16x32xbf16, #tpu.memory_space<vmem>>, vector<16x32xbf16>
    tpu.vector_store %arg8[%c0_25, %c0_26], %111 {strides = array<i32>} : memref<16x32xbf16, #tpu.memory_space<vmem>>, vector<16x32xbf16>,
    return
  }
  func.func @transform_0(%arg0: i32) -> (i32, i32) {
    %c0_i32 = arith.constant 0 : i32
    %c0_i32_0 = arith.constant 0 : i32
    return %arg0, %c0_i32 : i32, i32
  }
  func.func @transform_1(%arg0: i32) -> (i32, i32) {
    %c0_i32 = arith.constant 0 : i32
    %c0_i32_0 = arith.constant 0 : i32
    %c0_i32_1 = arith.constant 0 : i32
    return %c0_i32, %c0_i32_0 : i32, i32
  }
  func.func @transform_2(%arg0: i32) -> (i32, i32) {
    %c0_i32 = arith.constant 0 : i32
    %c0_i32_0 = arith.constant 0 : i32
    %c0_i32_1 = arith.constant 0 : i32
    return %c0_i32, %c0_i32_0 : i32, i32
  }
  func.func @transform_3(%arg0: i32) -> (i32, i32) {
    %c0_i32 = arith.constant 0 : i32
    %c0_i32_0 = arith.constant 0 : i32
    %c0_i32_1 = arith.constant 0 : i32
    return %c0_i32, %c0_i32_0 : i32, i32
  }
  func.func @transform_4(%arg0: i32) -> (i32, i32) {
    %c0_i32 = arith.constant 0 : i32
    %c0_i32_0 = arith.constant 0 : i32
    %c0_i32_1 = arith.constant 0 : i32
    return %c0_i32, %c0_i32_0 : i32, i32
  }
  func.func @transform_5(%arg0: i32) -> (i32, i32) {
    %c0_i32 = arith.constant 0 : i32
    %c0_i32_0 = arith.constant 0 : i32
    %c0_i32_1 = arith.constant 0 : i32
    return %c0_i32, %c0_i32_0 : i32, i32
  }
  func.func @transform_6(%arg0: i32) -> (i32, i32, i32) {
    %c0_i32 = arith.constant 0 : i32
    %c0_i32_0 = arith.constant 0 : i32
    %c0_i32_1 = arith.constant 0 : i32
    return %arg0, %c0_i32, %c0_i32_0 : i32, i32, i32
  }
  func.func @transform_7(%arg0: i32) -> (i32, i32) {
    %c0_i32 = arith.constant 0 : i32
    %c0_i32_0 = arith.constant 0 : i32
    return %arg0, %c0_i32 : i32, i32
  }
}

module attributes {stable_mosaic.version = 11 : i64} {
  func.func @_attn_out_mlp_kernel(%arg0: i32, %arg1: memref<16x32xbf16, #tpu.memory_space<vmem>>, %arg2: memref<16x32xbf16, #tpu.memory_space<vmem>>, %arg3: memref<32x32xbf16, #tpu.memory_space<vmem>>, %arg4: memref<1x32xf32, #tpu.memory_space<vmem>>, %arg5: memref<32x128xbf16, #tpu.memory_space<vmem>>, %arg6: memref<64x32xbf16, #tpu.memory_space<vmem>>, %arg7: memref<16x32xbf16, #tpu.memory_space<vmem>>) attributes {dimension_semantics = [#tpu.dimension_semantics<parallel>], iteration_bounds = array<i64: 2>, scalar_prefetch = 0 : i64, scratch_operands = 0 : i64, tpu.core_type = #tpu.core_type<tc>, window_params = [{transform_indices = @transform_0, window_bounds = array<i64: 16, 32>}, {transform_indices = @transform_1, window_bounds = array<i64: 16, 32>}, {pipeline_mode = #tpu.pipeline_mode<synchronous>, transform_indices = @transform_2, window_bounds = array<i64: 32, 32>}, {pipeline_mode = #tpu.pipeline_mode<synchronous>, transform_indices = @transform_3, window_bounds = array<i64: 1, 32>}, {pipeline_mode = #tpu.pipeline_mode<synchronous>, transform_indices = @transform_4, window_bounds = array<i64: 32, 128>}, {pipeline_mode = #tpu.pipeline_mode<synchronous>, transform_indices = @transform_5, window_bounds = array<i64: 64, 32>}, {transform_indices = @transform_6, window_bounds = array<i64: 16, 32>}]} {
    %c0 = arith.constant 0 : index
    %c0_0 = arith.constant 0 : index
    %0 = vector.load %arg2[%c0, %c0_0] : memref<16x32xbf16, #tpu.memory_space<vmem>>, vector<16x32xbf16>
    %1 = arith.extf %0 : vector<16x32xbf16> to vector<16x32xf32>
    %c0_1 = arith.constant 0 : index
    %c0_2 = arith.constant 0 : index
    %2 = vector.load %arg1[%c0_1, %c0_2] : memref<16x32xbf16, #tpu.memory_space<vmem>>, vector<16x32xbf16>
    %c0_3 = arith.constant 0 : index
    %c0_4 = arith.constant 0 : index
    %3 = vector.load %arg3[%c0_3, %c0_4] : memref<32x32xbf16, #tpu.memory_space<vmem>>, vector<32x32xbf16>
    %cst = arith.constant dense<0.000000e+00> : vector<16x32xf32>
    %4 = tpu.matmul %2, %3, %cst {dimension_numbers = #tpu.dot_dimension_numbers<[1], [0], [0], [1], [0, 0, 1, 1], [], []>} : vector<16x32xbf16>, vector<32x32xbf16>, vector<16x32xf32> -> vector<16x32xf32>
    %5 = arith.addf %1, %4 : vector<16x32xf32>
    %c0_5 = arith.constant 0 : index
    %c0_6 = arith.constant 0 : index
    %6 = vector.load %arg4[%c0_5, %c0_6] : memref<1x32xf32, #tpu.memory_space<vmem>>, vector<1x32xf32>
    %7 = arith.mulf %5, %5 : vector<16x32xf32>
    %cst_7 = arith.constant dense<0.000000e+00> : vector<16xf32>
    %8 = vector.multi_reduction <add>, %7, %cst_7 [1] : vector<16x32xf32> to vector<16xf32>
    %9 = vector.shape_cast %8 : vector<16xf32> to vector<16x1xf32>
    %cst_8 = arith.constant 3.200000e+01 : f32
    %10 = vector.broadcast %cst_8 : f32 to vector<16x1xf32>
    %11 = arith.divf %9, %10 : vector<16x1xf32>
    %cst_9 = arith.constant 9.99999997E-7 : f32
    %12 = vector.broadcast %cst_9 : f32 to vector<16x1xf32>
    %13 = arith.addf %11, %12 : vector<16x1xf32>
    %14 = math.rsqrt %13 : vector<16x1xf32>
    %15 = vector.broadcast %14 : vector<16x1xf32> to vector<16x32xf32>
    %16 = arith.mulf %5, %15 : vector<16x32xf32>
    %17 = vector.broadcast %6 : vector<1x32xf32> to vector<16x32xf32>
    %18 = arith.mulf %16, %17 : vector<16x32xf32>
    %19 = arith.truncf %18 : vector<16x32xf32> to vector<16x32xbf16>
    %c0_10 = arith.constant 0 : index
    %c0_11 = arith.constant 0 : index
    %20 = vector.load %arg5[%c0_10, %c0_11] : memref<32x128xbf16, #tpu.memory_space<vmem>>, vector<32x128xbf16>
    %cst_12 = arith.constant dense<0.000000e+00> : vector<16x128xf32>
    %21 = tpu.matmul %19, %20, %cst_12 {dimension_numbers = #tpu.dot_dimension_numbers<[1], [0], [0], [1], [0, 0, 1, 1], [], []>} : vector<16x32xbf16>, vector<32x128xbf16>, vector<16x128xf32> -> vector<16x128xf32>
    %22 = vector.extract_strided_slice %21 {offsets = [0, 0], sizes = [16, 64], strides = [1, 1]} : vector<16x128xf32> to vector<16x64xf32>
    %23 = vector.extract_strided_slice %21 {offsets = [0, 64], sizes = [16, 64], strides = [1, 1]} : vector<16x128xf32> to vector<16x64xf32>
    %24 = arith.negf %22 : vector<16x64xf32>
    %25 = math.exp %24 : vector<16x64xf32>
    %cst_13 = arith.constant 1.000000e+00 : f32
    %26 = vector.broadcast %cst_13 : f32 to vector<16x64xf32>
    %27 = arith.addf %26, %25 : vector<16x64xf32>
    %28 = arith.divf %26, %27 : vector<16x64xf32>
    %29 = arith.mulf %22, %28 : vector<16x64xf32>
    %30 = arith.mulf %29, %23 : vector<16x64xf32>
    %31 = arith.truncf %30 : vector<16x64xf32> to vector<16x64xbf16>
    %c0_14 = arith.constant 0 : index
    %c0_15 = arith.constant 0 : index
    %32 = vector.load %arg6[%c0_14, %c0_15] : memref<64x32xbf16, #tpu.memory_space<vmem>>, vector<64x32xbf16>
    %cst_16 = arith.constant dense<0.000000e+00> : vector<16x32xf32>
    %33 = tpu.matmul %31, %32, %cst_16 {dimension_numbers = #tpu.dot_dimension_numbers<[1], [0], [0], [1], [0, 0, 1, 1], [], []>} : vector<16x64xbf16>, vector<64x32xbf16>, vector<16x32xf32> -> vector<16x32xf32>
    %34 = arith.addf %5, %33 : vector<16x32xf32>
    %35 = arith.truncf %34 : vector<16x32xf32> to vector<16x32xbf16>
    %c0_17 = arith.constant 0 : index
    %c0_18 = arith.constant 0 : index
    %36 = vector.load %arg7[%c0_17, %c0_18] : memref<16x32xbf16, #tpu.memory_space<vmem>>, vector<16x32xbf16>
    tpu.vector_store %arg7[%c0_17, %c0_18], %35 {strides = array<i32>} : memref<16x32xbf16, #tpu.memory_space<vmem>>, vector<16x32xbf16>,
    return
  }
  func.func @transform_0(%arg0: i32) -> (i32, i32) {
    %c0_i32 = arith.constant 0 : i32
    %c0_i32_0 = arith.constant 0 : i32
    return %arg0, %c0_i32 : i32, i32
  }
  func.func @transform_1(%arg0: i32) -> (i32, i32) {
    %c0_i32 = arith.constant 0 : i32
    %c0_i32_0 = arith.constant 0 : i32
    return %arg0, %c0_i32 : i32, i32
  }
  func.func @transform_2(%arg0: i32) -> (i32, i32) {
    %c0_i32 = arith.constant 0 : i32
    %c0_i32_0 = arith.constant 0 : i32
    %c0_i32_1 = arith.constant 0 : i32
    return %c0_i32, %c0_i32_0 : i32, i32
  }
  func.func @transform_3(%arg0: i32) -> (i32, i32) {
    %c0_i32 = arith.constant 0 : i32
    %c0_i32_0 = arith.constant 0 : i32
    %c0_i32_1 = arith.constant 0 : i32
    return %c0_i32, %c0_i32_0 : i32, i32
  }
  func.func @transform_4(%arg0: i32) -> (i32, i32) {
    %c0_i32 = arith.constant 0 : i32
    %c0_i32_0 = arith.constant 0 : i32
    %c0_i32_1 = arith.constant 0 : i32
    return %c0_i32, %c0_i32_0 : i32, i32
  }
  func.func @transform_5(%arg0: i32) -> (i32, i32) {
    %c0_i32 = arith.constant 0 : i32
    %c0_i32_0 = arith.constant 0 : i32
    %c0_i32_1 = arith.constant 0 : i32
    return %c0_i32, %c0_i32_0 : i32, i32
  }
  func.func @transform_6(%arg0: i32) -> (i32, i32) {
    %c0_i32 = arith.constant 0 : i32
    %c0_i32_0 = arith.constant 0 : i32
    return %arg0, %c0_i32 : i32, i32
  }
}

</mosaic_0001>

<bundles_post_ra>
// kernel: text_decoder_forward.9
= control target key start
LH: loop header
LB: loop body
LE: loop exit
PB: predicated region body
PF: predicated region fallthrough
CT: control target
= control target key end

     0   :  { %8 = vsyncpa [#allocation3], 0  ;;  %s624_s0 = inlined_call_operand.vmem [shape: bf16[32,32], index: 0, kind: input, shape index: {}]   ;;  %s625_s1 = inlined_call_operand.vmem [shape: f32[1,32], index: 1, kind: input, shape index: {}]   ;;  %s626_s2 = inlined_call_operand.vmem [shape: bf16[32,128], index: 2, kind: input, shape index: {}]   ;;  %s627_s3 = inlined_call_operand.hbm [shape: f32[32,128], index: 3, kind: output, shape index: {}]  }
   0x1   :  { %10 = vsyncpa [#allocation3 + $0x1], 0  ;;  %s511_s12 = smov 0   ;;  %s513_s13 = smov 0  }
   0x2   :  { %s515_s14 = smov 0   ;;  %s517_s15 = smov 0  }
   0x3 LB: > { %s532_s16 = sadd.s32 4294967295, %s484_s15   ;;  %s343_s17 = sadd.s32 4294967294, %s484_s15   ;;  %s484_s15 = sphi %s517_s15, %s633_s15   ;;  %s480_s14 = sphi %s515_s14, %s632_s14   ;;  %s476_s13 = sphi %s513_s13, %s631_s13   ;;  %s472_s12 = sphi %s511_s12, %s630_s12  }
   0x4   : > { %s536_s18 = sadd.s32 1, %s484_s15   ;;  %s91_s19 = sadd.s32 1, %s480_s14 }
   0x5   : > { %s88_s20 = ssub.s32 %s484_s15, %s536_s18  ;;  %p101_p0 = scmp.ne.s32.totalorder %s480_s14, %s476_s13 }
   0x6   : > { %p89_p1 = scmp.eq.s32.totalorder %s88_s20, 0  ;;  %p102_p2 = scmp.eq.s32.totalorder %s532_s16, 1 }
   0x7   : > { %p107_p3 = scmp.ne.s32.totalorder %s476_s13, %s472_s12  ;;  %p108_p4 = scmp.eq.s32.totalorder %s343_s17, 1 }
   0x8   : > { %s547_s21 = scalar_select %p89_p1, %s480_s14, %s91_s19  }
   0x9   : > { %p549_p5 = por %p102_p2, %p101_p0  ;;  %p553_p6 = por %p108_p4, %p107_p3 }
   0xa   : > { %p346_p7 = scmp.ge.s32.totalorder %s484_s15, 1  ;;  %p141_p8 = scmp.lt.s32.totalorder %s484_s15, 3 }
   0xc   : > { %p142_p9 = pnand %p346_p7, %p141_p8 }
   0xd   : > { %s348_s24 = sshll.u32 (!%p142_p9), %s532_s16, 1  ;;  %s162_s8 = sand.u32 (!%p142_p9), 1, %s476_s13  }
   0xe   : > { %145 = sbr.rel (%p142_p9) target bundleno = 406 (0x196), region = 32  ;;  %p166_p10 = scmp.lt.s32.totalorder (!%p142_p9), %s348_s24, 3 }
   0xf   : > { %s347_s9 = sshll.u32 (!%p142_p9), %s162_s8, 4  ;;  %s359_s17 = sshll.u32 (!%p142_p9), %s532_s16, 8 }
  0x10   : > { %s164_s10 = scalar_lea.vmem (!%p142_p9), [#allocation2], %s347_s9  ;;  %s488_s16 = smov (!%p142_p9), [#allocation2]  }
  0x11   : > { %s281_s11 = sshll.u32 (!%p142_p9), %s164_s10, 4  ;;  %s428_s27 = sshll.u32 (!%p142_p9), %s488_s16, 4  ;;  %s577_s11 = int_to_ptr.vmem [resolvable:$true] %s281_s11  ;;  %s429_s27 = int_to_ptr.vmem [resolvable:$false] %s428_s27 }
  0x12   : > { %s424_s26 = scalar_lea.vmem (!%p142_p9), %s577_s11, 256  ;;  %p431_p0 = scmp.lt.s32.totalorder (!%p142_p9), %s577_s11, %s429_s27 }
  0x13   : > { %s635_s24 = smov (!%p166_p10, %s348_s24), 3  ;;  %vm180_vm0 = vcmask 261120   ;;  %v418_v7 = vld [vmem:[%s626_s2 + $0x8] sm:$0xff]   ;;  %v486_v8 = vmov 0.0   ;;  %vm487_vm1 = vmmov 0   ;;  %v419_v9 = vld [vmem:[%s626_s2] sm:$0xff]   ;;  %p425_p11 = scmp.ne.s32.totalorder %s577_s11, %s424_s26 }
  0x14   : > { %s349_s25 = sshll.u32 %s635_s24, 2  ;;  %367 = vmatprep.subr.bf16.mxu0 %v486_v8  ;;  %371 = vmatprep.mubr.msk.bf16.mxu0 %vm487_vm1, %v486_v8  ;;  %v350_v19 = vld [vmem:[%s625_s1] ss:$0 sm:$0xff]  ;;  %s582_s24 = scalar_lea.hbm %s627_s3, %s359_s17 }
  0x15   : > { %s169_s28 = scalar_lea.vmem %s624_s0, %s349_s25  ;;  %368 = vmatpush3.bf16.msra.mxu0 %v418_v7  ;;  %s584_s25 = scalar_lea.sflag [#allocation3], %s162_s8 }
  0x16   : > { %v361_v0 = vld [vmem:[%s169_s28] sm:$0xff]   ;;  %369 = vmatprep.subr.bf16.mxu0 %v486_v8  ;;  %p426_p12 = pnand %p425_p11, %p549_p5  ;;  %s430_s28 = scalar_lea.vmem %s429_s27, 512 }
  0x17   : > { %v362_v1 = vunpack.c.l.bf16 %v361_v0  ;;  %v363_v2 = vunpack.c.h.bf16 %v361_v0  ;;  %p432_p1 = scmp.lt.s32.totalorder %s430_s28, %s424_s26 }
  0x18   : > { %p427_p13 = pneg %p426_p12 }
  0x19   : > { %v178_v3 = vmul.f32 %v362_v1, %v362_v1  ;;  %v179_v4 = vmul.f32 %v363_v2, %v363_v2  ;;  %370 = vmatpush3.bf16.msra.mxu0 %v419_v9  ;;  %p433_p2 = por %p432_p1, %p431_p0 }
  0x1b   : > { %v181_v5 = vsel %vm180_vm0, %v178_v3, 0.0  ;;  %v184_v6 = vsel %vm180_vm0, %v179_v4, 0.0  ;;  %p434_p3 = pnand %p433_p2, %p427_p13 }
  0x1c   : > { %182 = vadd.xlane.f32.xlu0 %v181_v5 }
  0x20   : > { %185 = vadd.xlane.f32.xlu0 %v184_v6 }
  0xa5   : > { %v183_v10 = vpop.xlane.xlu0 %182 }
  0xa6   : > { %v188_v11 = vmul.f32 0.03125, %v183_v10 }
  0xa8   : > { %v190_v12 = vadd.f32 1e-06, %v188_v11 }
  0xa9   : > { %v186_v13 = vpop.xlane.xlu0 %185 }
  0xaa   : > { %420 = vrsqrt.f32 %v190_v12  ;;  %v189_v14 = vmul.f32 0.03125, %v186_v13 }
  0xac   : > { %v191_v15 = vadd.f32 1e-06, %v189_v14 }
  0xae   : > { %422 = vrsqrt.f32 %v191_v15 }
  0xb7   : > { %v421_v16 = vpop.eup %420 }
  0xb8   : > { %v194_v17 = vmul.f32 %v421_v16, %v362_v1 }
  0xba   : > { %v202_v21 = vmul.f32 %v350_v19, %v194_v17 }
  0xbb   : > { %v423_v18 = vpop.eup %422 }
  0xbc   : > { %v195_v20 = vmul.f32 %v423_v18, %v363_v2 }
  0xbe   : > { %v203_v22 = vmul.f32 %v350_v19, %v195_v20 }
  0xc0   : > { %v204_v23 = vpack.c.bf16 %v203_v22, %v202_v21 }
  0xc2   : > { %372 = vmatmul.mubr.msk.bf16.vlgmr.msra.gmra.mxu0 %vm180_vm0, %v204_v23 }
 0x182   : > { %v258_v24 = vpop.f32.mrf.mxu0 }
 0x183   : > { %265 = vst [vmem:[%s164_s10] sm:$0xff] %v258_v24 }
 0x184   : > { %v373_v25 = vpop.f32.mrf.mxu0 }
 0x186   : > { %v261_v26 = vpop.f32.mrf.mxu0 }
 0x187   : > { %266 = vst [vmem:[%s164_s10 + $0x8] sm:$0xff] %v261_v26 }
 0x188   : > { %v374_v27 = vpop.f32.mrf.mxu0 }
 0x189   : > { %437 = shalt.err (!%p434_p3)
}
 0x18a   : > { %s438_s29 = scalar_lea.hbm %s582_s24, 256  ;;  %s442_s5 = scalar_lea.hbm %s627_s3, 512 }
 0x18b   : > { %p439_p4 = scmp.ne.s32.totalorder %s582_s24, %s438_s29  ;;  %p443_p9 = scmp.lt.s32.totalorder %s582_s24, %s627_s3 }
 0x18c   : > { %p444_p10 = scmp.lt.s32.totalorder %s442_s5, %s438_s29 }
 0x18d   : > { %p440_p7 = pnand %p439_p4, %p549_p5 }
 0x18e   : > { %p445_p11 = por %p444_p10, %p443_p9 }
 0x18f   : > { %p441_p8 = pneg %p440_p7 }
 0x191   : > { %p446_p12 = pnand %p445_p11, %p441_p8 }
 0x193   : > { %449 = shalt.err (!%p446_p12)
}
 0x194   : > { %s489_s8 = smov 128   ;;  %s490_s9 = smov 8  }
 0x195   : > { %375 = dma.vmem_to_hbm [thread:$0]  (%p549_p5), %s577_s11, 256, %s582_s24, %s584_s25, %s489_s8, %s489_s8, %s490_s9  }
 0x196 PF: > { %p381_p13 = scmp.ge.s32.totalorder %s484_s15, 2  ;;  %s296_s10 = sand.u32 1, %s472_s12  }
 0x197   : > { %s297_s17 = scalar_lea.sflag [#allocation3], %s296_s10 }
 0x198   : > { %p378_p0 = pnand %p381_p13, %p553_p6 }
 0x19a   : > { %p379_p1 = pneg %p378_p0 }
 0x19c   : > { %467 = dma.done.wait (%p379_p1), %s297_s17, 256  }
 0x19d   : > { %469 = vsyncadd (%p379_p1), %s297_s17, 4294967040  ;;  %p13_p2 = scmp.ge.s32.totalorder %s536_s18, 4   ;;  %s630_s12 = smov %s476_s13 }
 0x19e   : > { %s631_s13 = smov %s480_s14  ;;  %s632_s14 = smov %s547_s21 }
 0x19f   : > { %s633_s15 = smov %s536_s18  ;;  %15 = sbr.rel (!%p13_p2) target bundleno = 3 (0x3), region = 67 }
 0x1a4   :  { %302 = vsyncpa [#allocation3], 1 }
 0x1a5   :  { %304 = vsyncpa [#allocation3 + $0x1], 1 }

// kernel: text_decoder_forward.6
= control target key start
LH: loop header
LB: loop body
LE: loop exit
PB: predicated region body
PF: predicated region fallthrough
CT: control target
= control target key end

     0   :  { %s775_s21 = smov 0   ;;  %s854_s0 = inlined_call_operand.vmem [shape: bf16[32,32], index: 0, kind: input, shape index: {}]   ;;  %s855_s1 = inlined_call_operand.vmem [shape: bf16[32,32], index: 1, kind: input, shape index: {}]   ;;  %s856_s2 = inlined_call_operand.vmem [shape: bf16[32,32], index: 2, kind: input, shape index: {}]   ;;  %s857_s3 = inlined_call_operand.vmem [shape: f32[1,32], index: 3, kind: input, shape index: {}]   ;;  %s858_s4 = inlined_call_operand.vmem [shape: bf16[32,128], index: 4, kind: input, shape index: {}]   ;;  %s859_s5 = inlined_call_operand.vmem [shape: bf16[64,32], index: 5, kind: input, shape index: {}]   ;;  %s860_s6 = inlined_call_operand.vmem [shape: bf16[32,32], index: 6, kind: output, shape index: {}]  }
   0x1 LB: > { %s622_s22 = sadd.s32 4294967295, %s735_s21   ;;  %p626_p0 = scmp.ge.s32.totalorder %s735_s21, 1  ;;  %s735_s21 = sphi %s775_s21, %s16_s21  }
   0x2   : > { %p224_p1 = scmp.lt.s32.totalorder %s735_s21, 3 }
   0x4   : > { %p225_p2 = pnand %p626_p0, %p224_p1 }
   0x5   : > { %s627_s27 = sshll.u32 (!%p225_p2), %s622_s22, 1  ;;  %s739_s26 = smov (!%p225_p2), 64  }
   0x6   : > { %228 = sbr.rel (%p225_p2) target bundleno = 902 (0x386), region = 44  ;;  %p260_p3 = scmp.lt.s32.totalorder (!%p225_p2), %s627_s27, 3 }
   0xb   : > { %v708_v0 = vld [vmem:[%s856_s2 + $0x8] sm:$0xff]   ;;  %v737_v1 = vmov 0.0   ;;  %v709_v2 = vld [vmem:[%s856_s2] sm:$0xff]   ;;  %vm738_vm0 = vmmov 0   ;;  %s862_s27 = smov (!%p260_p3, %s627_s27), 3  ;;  %vm305_vm1 = vcmask 261120  }
   0xc   : > { %669 = vmatprep.subr.bf16.mxu1 %v737_v1  ;;  %685 = vmatprep.subr.bf16.mxu0 %v737_v1  ;;  %s794_s28 = sshll.u32 %s862_s27, 2  ;;  %v711_v17 = vld [vmem:[%s858_s4 + $0x8] sm:$0xff]   ;;  %v712_v18 = vld [vmem:[%s858_s4] sm:$0xff]   ;;  %v713_v33 = vld [vmem:[%s859_s5 + $0x18] sm:$0xff]   ;;  %vm496_vm2 = vcmask 523264   ;;  %vm551_vm3 = vcmask 257024  }
   0xd   : > { %670 = vmatpush3.bf16.msra.mxu1 %v708_v0  ;;  %673 = vmatprep.mubr.msk.bf16.mxu1 %vm738_vm0, %v737_v1  ;;  %s263_s7 = scalar_lea.vmem %s854_s0, %s794_s28  ;;  %s269_s10 = scalar_lea.vmem %s855_s1, %s794_s28  ;;  %v637_v28 = vld [vmem:[%s857_s3] ss:$0 sm:$0xff]  ;;  %v714_v34 = vld [vmem:[%s859_s5 + $0x10] sm:$0xff]   ;;  %v715_v35 = vld [vmem:[%s859_s5 + $0x8] sm:$0xff]  }
   0xe   : > { %671 = vmatprep.subr.bf16.mxu1 %v737_v1  ;;  %693 = vmatprep.mubr.msk.bf16.mxu0 %vm738_vm0, %v737_v1  ;;  %v710_v3 = vld [vmem:[%s263_s7] sm:$0xff]   ;;  %s275_s30 = scalar_lea.vmem %s860_s6, %s794_s28 }
   0xf   : > { %v655_v4 = vld [vmem:[%s269_s10] sm:$0xff]   ;;  %686 = vmatpush3.bf16.msra.mxu0 %v713_v33 }
  0x10   : > { %v656_v5 = vunpack.c.l.bf16 %v655_v4  ;;  %v657_v8 = vunpack.c.h.bf16 %v655_v4  ;;  %687 = vmatprep.subr.bf16.mxu0 %v737_v1  ;;  %v716_v36 = vld [vmem:[%s859_s5] sm:$0xff]  }
  0x11   : > { %672 = vmatpush3.bf16.msra.mxu1 %v709_v2 }
  0x12   : > { %677 = vmatprep.subr.bf16.mxu1 %v737_v1 }
  0x13   : > { %688 = vmatpush3.bf16.msra.mxu0 %v714_v34 }
  0x14   : > { %674 = vmatmul.mubr.msk.bf16.vlgmr.msra.gmra.mxu1 %vm305_vm1, %v710_v3  ;;  %689 = vmatprep.subr.bf16.mxu0 %v737_v1 }
  0x15   : > { %681 = vmatprep.mubr.msk.bf16.mxu1 %vm738_vm0, %v737_v1  ;;  %678 = vmatpush3.bf16.msra.mxu1 %v711_v17 }
  0x16   : > { %679 = vmatprep.subr.bf16.mxu1 %v737_v1 }
  0x17   : > { %690 = vmatpush3.bf16.msra.mxu0 %v715_v35 }
  0x18   : > { %691 = vmatprep.subr.bf16.mxu0 %v737_v1 }
  0x19   : > { %680 = vmatpush3.bf16.msra.mxu1 %v712_v18 }
  0x1b   : > { %692 = vmatpush3.bf16.msra.mxu0 %v716_v36 }
  0xd4   : > { %v343_v6 = vpop.f32.mrf.mxu1 }
  0xd5   : > { %v807_v7 = vadd.f32 %v656_v5, %v343_v6 }
  0xd6   : > { %v675_v9 = vpop.f32.mrf.mxu1 }
  0xd7   : > { %v353_v10 = vmul.f32 %v807_v7, %v807_v7 }
  0xd8   : > { %v346_v11 = vpop.f32.mrf.mxu1 }
  0xd9   : > { %v811_v12 = vadd.f32 %v657_v8, %v346_v11  ;;  %v355_v13 = vsel %vm305_vm1, %v353_v10, 0.0 }
  0xda   : > { %356 = vadd.xlane.f32.xlu0 %v355_v13  ;;  %v676_v14 = vpop.f32.mrf.mxu1 }
  0xdb   : > { %v354_v15 = vmul.f32 %v811_v12, %v811_v12 }
  0xdd   : > { %v358_v16 = vsel %vm305_vm1, %v354_v15, 0.0 }
  0xde   : > { %359 = vadd.xlane.f32.xlu0 %v358_v16 }
 0x163   : > { %v357_v19 = vpop.xlane.xlu0 %356 }
 0x164   : > { %v362_v20 = vmul.f32 0.03125, %v357_v19 }
 0x166   : > { %v364_v21 = vadd.f32 1e-06, %v362_v20 }
 0x167   : > { %v360_v22 = vpop.xlane.xlu0 %359 }
 0x168   : > { %717 = vrsqrt.f32 %v364_v21  ;;  %v363_v23 = vmul.f32 0.03125, %v360_v22 }
 0x16a   : > { %v365_v24 = vadd.f32 1e-06, %v363_v23 }
 0x16c   : > { %719 = vrsqrt.f32 %v365_v24 }
 0x175   : > { %v718_v25 = vpop.eup %717 }
 0x176   : > { %v368_v26 = vmul.f32 %v718_v25, %v807_v7 }
 0x178   : > { %v376_v30 = vmul.f32 %v637_v28, %v368_v26 }
 0x179   : > { %v720_v27 = vpop.eup %719 }
 0x17a   : > { %v369_v29 = vmul.f32 %v720_v27, %v811_v12 }
 0x17c   : > { %v377_v31 = vmul.f32 %v637_v28, %v369_v29 }
 0x17e   : > { %v378_v32 = vpack.c.bf16 %v377_v31, %v376_v30 }
 0x180   : > { %682 = vmatmul.mubr.msk.bf16.vlgmr.msra.gmra.mxu1 %vm305_vm1, %v378_v32 }
 0x240   : > { %v432_v37 = vpop.f32.mrf.mxu1 }
 0x241   : > { %455 = vrot.lane.b32.xlu1 %v432_v37, %s739_s26  ;;  %v641_v41 = vmul.f32 -1.442695, %v432_v37 }
 0x242   : > { %v683_v38 = vpop.f32.mrf.mxu1 }
 0x243   : > { %721 = vpow2.f32 %v641_v41 }
 0x244   : > { %v435_v39 = vpop.f32.mrf.mxu1 }
 0x245   : > { %457 = vrot.lane.b32.xlu1 %v435_v39, %s739_s26  ;;  %v642_v42 = vmul.f32 -1.442695, %v435_v39 }
 0x246   : > { %v684_v40 = vpop.f32.mrf.mxu1 }
 0x247   : > { %723 = vpow2.f32 %v642_v42 }
 0x250   : > { %v722_v43 = vpop.eup %721 }
 0x251   : > { %v445_v45 = vadd.f32 1.0, %v722_v43 }
 0x253   : > { %725 = vrcp.f32 %v445_v45 }
 0x254   : > { %v724_v44 = vpop.eup %723 }
 0x255   : > { %v446_v46 = vadd.f32 1.0, %v724_v44 }
 0x257   : > { %727 = vrcp.f32 %v446_v46 }
 0x260   : > { %v726_v47 = vpop.eup %725 }
 0x261   : > { %v451_v50 = vmul.f32 %v726_v47, %v432_v37 }
 0x264   : > { %v728_v48 = vpop.eup %727 }
 0x265   : > { %v452_v51 = vmul.f32 %v728_v48, %v435_v39 }
 0x2b3   : > { %v456_v49 = vpop.permute.xlu1 %455 }
 0x2b4   : > { %v461_v53 = vmul.f32 %v456_v49, %v451_v50 }
 0x2b7   : > { %v458_v52 = vpop.permute.xlu1 %457 }
 0x2b8   : > { %v462_v54 = vmul.f32 %v458_v52, %v452_v51 }
 0x2ba   : > { %v463_v55 = vpack.c.bf16 %v462_v54, %v461_v53 }
 0x2bc   : > { %694 = vmatmul.mubr.msk.bf16.vlgmr.msra.gmra.mxu0 %vm496_vm2, %v463_v55 }
 0x37c   : > { %v534_v56 = vpop.f32.mrf.mxu0 }
 0x37d   : > { %v541_v57 = vadd.f32 %v534_v56, %v807_v7 }
 0x37e   : > { %v695_v58 = vpop.f32.mrf.mxu0 }
 0x37f   : > { %v652_v59 = vpack.c.bf16 %v541_v57, %v541_v57 }
 0x380   : > { %v537_v60 = vpop.f32.mrf.mxu0 }
 0x381   : > { %552 = vst.msk [vmem:[%s275_s30] sm:$0xf] %vm551_vm3, %v652_v59  ;;  %v542_v61 = vadd.f32 %v537_v60, %v811_v12 }
 0x382   : > { %v696_v62 = vpop.f32.mrf.mxu0 }
 0x383   : > { %v653_v63 = vpack.c.bf16 %v542_v61, %v542_v61 }
 0x385   : > { %553 = vst.msk [vmem:[%s275_s30 + $0x4] sm:$0xf] %vm551_vm3, %v653_v63 }
 0x386 PF: > { %s16_s21 = sadd.s32 1, %s735_s21  }
 0x387   : > { %p13_p4 = scmp.ge.s32.totalorder %s16_s21, 4  }
 0x389   :  { %15 = sbr.rel (!%p13_p4) target bundleno = 1 (0x1), region = 77 }

// kernel: text_decoder_forward.5
= control target key start
LH: loop header
LB: loop body
LE: loop exit
PB: predicated region body
PF: predicated region fallthrough
CT: control target
= control target key end

     0   :  { %s1288_s24 = smov 0   ;;  %s1478_s0 = inlined_call_operand.vmem [shape: bf16[32,32], index: 0, kind: input, shape index: {}]   ;;  %s1479_s1 = inlined_call_operand.vmem [shape: f32[1,32], index: 1, kind: input, shape index: {}]   ;;  %s1480_s2 = inlined_call_operand.vmem [shape: bf16[32,64], index: 2, kind: input, shape index: {}]   ;;  %s1481_s3 = inlined_call_operand.vmem [shape: f32[1,64], index: 3, kind: input, shape index: {}]   ;;  %s1482_s4 = inlined_call_operand.vmem [shape: f32[16,8], index: 4, kind: input, shape index: {}]   ;;  %s1483_s5 = inlined_call_operand.vmem [shape: f32[16,8], index: 5, kind: input, shape index: {}]   ;;  %s1484_s6 = inlined_call_operand.vmem [shape: f32[2,16,16], index: 6, kind: input, shape index: {}]   ;;  %s1485_s7 = inlined_call_operand.vmem [shape: bf16[32,32], index: 7, kind: output, shape index: {}]  }
   0x1 LB: > { %s1294_s25 = sadd.s32 4294967295, %s1226_s24   ;;  %p1049_p0 = scmp.ge.s32.totalorder %s1226_s24, 1  ;;  %s1226_s24 = sphi %s1288_s24, %s17_s24  }
   0x2   : > { %p248_p1 = scmp.lt.s32.totalorder %s1226_s24, 3 }
   0x4   : > { %p249_p2 = pnand %p1049_p0, %p248_p1 }
   0x5   : > { %s1050_s26 = sshll.u32 (!%p249_p2), %s1294_s25, 1  ;;  %s1230_s16 = smov (!%p249_p2), 108  }
   0x6   : > { %252 = sbr.rel (%p249_p2) target bundleno = 1707 (0x6ab), region = 48  ;;  %p286_p3 = scmp.lt.s32.totalorder (!%p249_p2), %s1050_s26, 3 }
   0x7   : > { %s1231_s17 = smov (!%p249_p2), 100   ;;  %s1232_s18 = smov (!%p249_p2), 116  }
   0x8   : > { %s1233_s19 = smov (!%p249_p2), 84   ;;  %s1234_s22 = smov (!%p249_p2), 24  }
   0x9   : > { %s1235_s23 = smov (!%p249_p2), 92   ;;  %s1236_s28 = smov (!%p249_p2), 124  }
   0xa   : > { %s1237_s12 = smov (!%p249_p2), 32   ;;  %s1238_s13 = smov (!%p249_p2), 8  }
   0xb   : > { %s1487_s26 = smov (!%p286_p3, %s1050_s26), 3  ;;  %vm310_vm0 = vcmask 261120   ;;  %v1182_v7 = vld [vmem:[%s1480_s2 + $0x8] sm:$0xff]   ;;  %v1228_v8 = vmov 0.0   ;;  %vm1229_vm1 = vmmov 0   ;;  %v1183_v9 = vld [vmem:[%s1480_s2] sm:$0xff]  }
   0xc   : > { %s1051_s27 = sshll.u32 %s1487_s26, 2  ;;  %1095 = vmatprep.subr.bf16.mxu0 %v1228_v8  ;;  %1099 = vmatprep.mubr.msk.bf16.mxu0 %vm1229_vm1, %v1228_v8  ;;  %v1056_v19 = vld [vmem:[%s1479_s1] ss:$0 sm:$0xff]  ;;  %v1335_v31 = vld [vmem:[%s1482_s4 + $0x8] sm:$0xff]  ;;  %vm432_vm2 = vcmask 31744   ;;  %s1239_s14 = smov 40  }
   0xd   : > { %s289_s30 = scalar_lea.vmem %s1478_s0, %s1051_s27  ;;  %1096 = vmatpush3.bf16.msra.mxu0 %v1182_v7  ;;  %v1057_v24 = vld [vmem:[%s1481_s3] ss:$0 sm:$0xff]  ;;  %v1363_v39 = vld [vmem:[%s1483_s5 + $0x8] sm:$0xff]  ;;  %s1240_s15 = smov 16   ;;  %vm510_vm3 = vcmask 64512   ;;  %vm569_vm4 = vcmask 130048  }
   0xe   : > { %v1077_v0 = vld [vmem:[%s289_s30] sm:$0xff]   ;;  %1097 = vmatprep.subr.bf16.mxu0 %v1228_v8  ;;  %s1245_s20 = smov 112   ;;  %p291_p4 = scmp.lt.s32.totalorder %s1294_s25, 1  ;;  %vm963_vm5 = vcmask 195584   ;;  %vm974_vm6 = vcmask 257024  }
   0xf   : > { %v1078_v1 = vunpack.c.l.bf16 %v1077_v0  ;;  %v1079_v2 = vunpack.c.h.bf16 %v1077_v0  ;;  %v1348_v32 = vld [vmem:[%s1482_s4] sm:$0xff]  ;;  %s1247_s30 = smov 80   ;;  %s300_s9 = scalar_lea.vmem %s1485_s7, %s1051_s27 }
  0x10   : > { %v1355_v33 = vld [vmem:[%s1483_s5] sm:$0xff]  ;;  %s1489_s25 = smov (!%p291_p4, %s1294_s25), 1 }
  0x11   : > { %v308_v3 = vmul.f32 %v1078_v1, %v1078_v1  ;;  %v309_v4 = vmul.f32 %v1079_v2, %v1079_v2  ;;  %1098 = vmatpush3.bf16.msra.mxu0 %v1183_v9  ;;  %s1073_s21 = sshll.u32 %s1489_s25, 4  ;;  %s1246_s25 = smov 72  }
  0x12   : > { %s295_s29 = scalar_lea.vmem %s1484_s6, %s1073_s21 }
  0x13   : > { %v311_v5 = vsel %vm310_vm0, %v308_v3, 0.0  ;;  %v314_v6 = vsel %vm310_vm0, %v309_v4, 0.0 }
  0x14   : > { %312 = vadd.xlane.f32.xlu0 %v311_v5 }
  0x18   : > { %315 = vadd.xlane.f32.xlu0 %v314_v6 }
  0x9d   : > { %v313_v10 = vpop.xlane.xlu0 %312 }
  0x9e   : > { %v318_v11 = vmul.f32 0.03125, %v313_v10 }
  0xa0   : > { %v320_v12 = vadd.f32 1e-06, %v318_v11 }
  0xa1   : > { %v316_v13 = vpop.xlane.xlu0 %315 }
  0xa2   : > { %1184 = vrsqrt.f32 %v320_v12  ;;  %v319_v14 = vmul.f32 0.03125, %v316_v13 }
  0xa4   : > { %v321_v15 = vadd.f32 1e-06, %v319_v14 }
  0xa6   : > { %1186 = vrsqrt.f32 %v321_v15 }
  0xaf   : > { %v1185_v16 = vpop.eup %1184 }
  0xb0   : > { %v324_v17 = vmul.f32 %v1185_v16, %v1078_v1 }
  0xb2   : > { %v332_v21 = vmul.f32 %v1056_v19, %v324_v17 }
  0xb3   : > { %v1187_v18 = vpop.eup %1186 }
  0xb4   : > { %v325_v20 = vmul.f32 %v1187_v18, %v1079_v2 }
  0xb6   : > { %v333_v22 = vmul.f32 %v1056_v19, %v325_v20 }
  0xb8   : > { %v334_v23 = vpack.c.bf16 %v333_v22, %v332_v21 }
  0xba   : > { %1100 = vmatmul.mubr.msk.bf16.vlgmr.msra.gmra.mxu0 %vm310_vm0, %v334_v23 }
 0x17a   : > { %v395_v25 = vpop.f32.mrf.mxu0 }
 0x17b   : > { %v1322_v26 = vadd.f32 %v1057_v24, %v395_v25 }
 0x17c   : > { %v1101_v27 = vpop.f32.mrf.mxu0 }
 0x17d   : > { %712 = vrot.lane.b32.xlu0 %v1322_v26, %s1230_s16  ;;  %426 = vrot.lane.b32.xlu1 %v1322_v26, %s1231_s17 }
 0x17e   : > { %v398_v28 = vpop.f32.mrf.mxu0 }
 0x17f   : > { %v1326_v29 = vadd.f32 %v1057_v24, %v398_v28 }
 0x180   : > { %v1102_v30 = vpop.f32.mrf.mxu0 }
 0x181   : > { %479 = vrot.lane.b32.xlu0 %v1326_v29, %s1232_s18  ;;  %428 = vrot.lane.b32.xlu1 %v1326_v29, %s1231_s17  ;;  %s1242_s17 = smov 120  }
 0x185   : > { %685 = vrot.lane.b32.xlu0 %v1326_v29, %s1233_s19  ;;  %714 = vrot.lane.b32.xlu1 %v1326_v29, %s1230_s16  ;;  %s1241_s16 = smov 4  }
 0x189   : > { %734 = vrot.lane.b32.xlu0 %v1335_v31, %s1234_s22  ;;  %420 = vrot.lane.b32.xlu1 %v1322_v26, %s1235_s23 }
 0x18d   : > { %451 = vrot.lane.b32.xlu1 %v1322_v26, %s1236_s28 }
 0x191   : > { %477 = vrot.lane.b32.xlu1 %v1322_v26, %s1232_s18  ;;  %s1243_s18 = smov 96  }
 0x195   : > { %422 = vrot.lane.b32.xlu1 %v1326_v29, %s1235_s23 }
 0x199   : > { %453 = vrot.lane.b32.xlu1 %v1326_v29, %s1236_s28 }
 0x19d   : > { %683 = vrot.lane.b32.xlu1 %v1322_v26, %s1233_s19  ;;  %s1244_s19 = smov 88  }
 0x1a1   : > { %732 = vrot.lane.b32.xlu1 %v1348_v32, %s1234_s22 }
 0x1ef   : > { %v713_v34 = vpop.permute.xlu0 %712  ;;  %v427_v35 = vpop.permute.xlu1 %426 }
 0x1f0   : > { %v740_v36 = vsel %vm432_vm2, %v427_v35, %v713_v34 }
 0x1f1   : > { %v742_v37 = vmul.f32 %v740_v36, %v1355_v33 }
 0x1f3   : > { %746 = vrot.lane.b32.xlu1 %v742_v37, %s1234_s22  ;;  %v429_v38 = vpop.permute.xlu1 %428  ;;  %v480_v49 = vpop.permute.xlu0 %479 }
 0x1f7   : > { %410 = vrot.lane.b32.xlu1 %v1348_v32, %s1237_s12  ;;  %v715_v40 = vpop.permute.xlu1 %714  ;;  %v686_v56 = vpop.permute.xlu0 %685 }
 0x1f8   : > { %v741_v41 = vsel %vm432_vm2, %v429_v38, %v715_v40  ;;  %v719_v63 = vsel %vm432_vm2, %v715_v40, %v480_v49 }
 0x1f9   : > { %v743_v42 = vmul.f32 %v741_v41, %v1363_v39  ;;  %v721_v1 = vmul.f32 %v719_v63, %v1363_v39 }
 0x1fb   : > { %748 = vrot.lane.b32.xlu0 %v743_v42, %s1234_s22  ;;  %v421_v43 = vpop.permute.xlu1 %420  ;;  %v735_v5 = vpop.permute.xlu0 %734 }
 0x1fc   : > { %v433_v44 = vsel %vm432_vm2, %v421_v43, %v427_v35  ;;  %v739_v6 = vmul.f32 %v735_v5, %v1326_v29 }
 0x1fd   : > { %v435_v45 = vmul.f32 %v433_v44, %v1355_v33 }
 0x1ff   : > { %412 = vrot.lane.b32.xlu0 %v1335_v31, %s1237_s12  ;;  %439 = vrot.lane.b32.xlu1 %v435_v45, %s1237_s12  ;;  %v1372_v46 = vpop.permute.xlu1 %451 }
 0x203   : > { %471 = vrot.lane.b32.xlu0 %v1335_v31, %s1238_s13  ;;  %469 = vrot.lane.b32.xlu1 %v1348_v32, %s1238_s13  ;;  %v478_v47 = vpop.permute.xlu1 %477 }
 0x204   : > { %v483_v48 = vsel %vm432_vm2, %v478_v47, %v1372_v46  ;;  %v718_v0 = vsel %vm432_vm2, %v713_v34, %v478_v47 }
 0x205   : > { %v485_v52 = vmul.f32 %v483_v48, %v1355_v33  ;;  %v720_v2 = vmul.f32 %v718_v0, %v1355_v33 }
 0x207   : > { %677 = vrot.lane.b32.xlu0 %v1335_v31, %s1239_s14  ;;  %675 = vrot.lane.b32.xlu1 %v1348_v32, %s1239_s14  ;;  %v423_v50 = vpop.permute.xlu1 %422 }
 0x208   : > { %v434_v51 = vsel %vm432_vm2, %v423_v50, %v429_v38  ;;  %v690_v58 = vsel %vm432_vm2, %v686_v56, %v423_v50 }
 0x209   : > { %v436_v53 = vmul.f32 %v434_v51, %v1363_v39  ;;  %v692_v61 = vmul.f32 %v690_v58, %v1363_v39 }
 0x20b   : > { %489 = vrot.lane.b32.xlu1 %v485_v52, %s1238_s13  ;;  %441 = vrot.lane.b32.xlu0 %v436_v53, %s1237_s12  ;;  %v1386_v54 = vpop.permute.xlu1 %453 }
 0x20c   : > { %v484_v55 = vsel %vm432_vm2, %v480_v49, %v1386_v54 }
 0x20d   : > { %v486_v57 = vmul.f32 %v484_v55, %v1363_v39 }
 0x20f   : > { %491 = vrot.lane.b32.xlu0 %v486_v57, %s1238_s13  ;;  %v684_v59 = vpop.permute.xlu1 %683 }
 0x210   : > { %v689_v60 = vsel %vm432_vm2, %v684_v59, %v421_v43 }
 0x211   : > { %v691_v62 = vmul.f32 %v689_v60, %v1355_v33 }
 0x213   : > { %697 = vrot.lane.b32.xlu0 %v692_v61, %s1239_s14  ;;  %695 = vrot.lane.b32.xlu1 %v691_v62, %s1239_s14  ;;  %v733_v3 = vpop.permute.xlu1 %732 }
 0x214   : > { %v738_v7 = vmul.f32 %v733_v3, %v1322_v26  ;;  %v450_v3 = vmul.f32 %v1335_v31, %v1326_v29 }
 0x217   : > { %706 = vrot.lane.b32.xlu0 %v1335_v31, %s1240_s15  ;;  %704 = vrot.lane.b32.xlu1 %v1348_v32, %s1240_s15 }
 0x21b   : > { %726 = vrot.lane.b32.xlu0 %v721_v1, %s1240_s15  ;;  %724 = vrot.lane.b32.xlu1 %v720_v2, %s1240_s15  ;;  %v449_v2 = vmul.f32 %v1348_v32, %v1322_v26 }
 0x21f   : > { %457 = vrot.lane.b32.xlu0 %v1322_v26, %s1241_s16 }
 0x265   : > { %v747_v4 = vpop.permute.xlu1 %746 }
 0x266   : > { %v752_v10 = vadd.f32 %v747_v4, %v738_v7 }
 0x269   : > { %v411_v8 = vpop.permute.xlu1 %410 }
 0x26a   : > { %v416_v19 = vmul.f32 %v411_v8, %v1322_v26 }
 0x26d   : > { %v749_v9 = vpop.permute.xlu0 %748 }
 0x26e   : > { %v753_v11 = vadd.f32 %v749_v9, %v739_v6 }
 0x270   : > { %v1157_v12 = vpack.i.bf16 %v753_v11, %v752_v10 }
 0x271   : > { %v413_v13 = vpop.permute.xlu0 %412  ;;  %v440_v14 = vpop.permute.xlu1 %439 }
 0x272   : > { %1158 = vrot.lane.b32.xlu1 %v1157_v12, %s1242_s17  ;;  %v417_v20 = vmul.f32 %v413_v13, %v1326_v29  ;;  %v445_v22 = vadd.f32 %v440_v14, %v416_v19  ;;  %v406_v12 = vld [vmem:[%s295_s29] sm:$0xff]  ;;  %v407_v14 = vld [vmem:[%s295_s29 + $0x8] sm:$0xff] }
 0x275   : > { %v472_v15 = vpop.permute.xlu0 %471  ;;  %v470_v16 = vpop.permute.xlu1 %469 }
 0x276   : > { %459 = vrot.lane.b32.xlu1 %v1326_v29, %s1241_s16  ;;  %v476_v25 = vmul.f32 %v472_v15, %v1326_v29  ;;  %v475_v27 = vmul.f32 %v470_v16, %v1322_v26 }
 0x279   : > { %v678_v17 = vpop.permute.xlu0 %677  ;;  %v676_v18 = vpop.permute.xlu1 %675 }
 0x27a   : > { %v682_v36 = vmul.f32 %v678_v17, %v1326_v29  ;;  %v681_v37 = vmul.f32 %v676_v18, %v1322_v26 }
 0x27d   : > { %v442_v21 = vpop.permute.xlu0 %441  ;;  %v490_v24 = vpop.permute.xlu1 %489 }
 0x27e   : > { %v446_v23 = vadd.f32 %v442_v21, %v417_v20  ;;  %v495_v34 = vadd.f32 %v490_v24, %v475_v27 }
 0x280   : > { %v447_v28 = vpack.c.bf16 %v446_v23, %v445_v22 }
 0x281   : > { %v492_v30 = vpop.permute.xlu0 %491 }
 0x282   : > { %v496_v35 = vadd.f32 %v492_v30, %v476_v25  ;;  %508 = vrot.lane.b32.xlu0 %v447_v28, %s1243_s18 }
 0x284   : > { %v1162_v38 = vpack.i.bf16 %v496_v35, %v495_v34 }
 0x285   : > { %v698_v40 = vpop.permute.xlu0 %697  ;;  %v696_v41 = vpop.permute.xlu1 %695 }
 0x286   : > { %v702_v42 = vadd.f32 %v698_v40, %v682_v36  ;;  %v701_v43 = vadd.f32 %v696_v41, %v681_v37  ;;  %1163 = vrot.lane.b32.xlu1 %v1162_v38, %s1242_s17 }
 0x288   : > { %v703_v44 = vpack.c.bf16 %v702_v42, %v701_v43 }
 0x289   : > { %v707_v45 = vpop.permute.xlu0 %706  ;;  %v705_v47 = vpop.permute.xlu1 %704 }
 0x28a   : > { %771 = vrot.lane.b32.xlu0 %v703_v44, %s1244_s19  ;;  %v711_v48 = vmul.f32 %v707_v45, %v1326_v29  ;;  %v710_v49 = vmul.f32 %v705_v47, %v1322_v26 }
 0x28d   : > { %v727_v50 = vpop.permute.xlu0 %726  ;;  %v725_v51 = vpop.permute.xlu1 %724 }
 0x28e   : > { %v731_v52 = vadd.f32 %v727_v50, %v711_v48  ;;  %v730_v53 = vadd.f32 %v725_v51, %v710_v49 }
 0x290   : > { %v762_v55 = vpack.c.bf16 %v731_v52, %v730_v53 }
 0x291   : > { %v458_v56 = vpop.permute.xlu0 %457 }
 0x292   : > { %766 = vrot.lane.b32.xlu1 %v762_v55, %s1245_s20  ;;  %v463_v58 = vsel %vm432_vm2, %v1372_v46, %v458_v56 }
 0x293   : > { %v465_v62 = vmul.f32 %v463_v58, %v1355_v33 }
 0x295   : > { %v467_v4 = vadd.f32 %v465_v62, %v449_v2 }
 0x2e4   : > { %v1159_v57 = vpop.permute.xlu1 %1158 }
 0x2e5   : > { %v1161_v59 = vunpack.i.h.bf16 %v1159_v57  ;;  %v1160_v60 = vunpack.i.l.bf16 %v1159_v57 }
 0x2e7   : > { %v763_v61 = vpack.c.bf16 %v1161_v59, %v1160_v60 }
 0x2e8   : > { %v460_v63 = vpop.permute.xlu1 %459 }
 0x2e9   : > { %v464_v0 = vsel %vm432_vm2, %v1386_v54, %v460_v63  ;;  %768 = vrot.lane.b32.xlu0 %v763_v61, %s1245_s20 }
 0x2ea   : > { %v466_v1 = vmul.f32 %v464_v0, %v1363_v39 }
 0x2ec   : > { %v468_v46 = vadd.f32 %v466_v1, %v450_v3 }
 0x2ee   : > { %v505_v5 = vpack.c.bf16 %v468_v46, %v467_v4 }
 0x2f0   : > { %1105 = vmatprep.mubr.msk.bf16.mxu1 %vm510_vm3, %v505_v5 }
 0x2f4   : > { %v509_v33 = vpop.permute.xlu0 %508 }
 0x2f5   : > { %1127 = vmatprep.subr.msk.bf16.mxu1 %vm510_vm3, %v509_v33  ;;  %v518_v54 = vsel %vm510_vm3, %v509_v33, 0 }
 0x2f6   : > { %1104 = vmatpush3.bf16.xpose.msra.mxu1 %v518_v54 }
 0x2f8   : > { %v1164_v39 = vpop.permute.xlu1 %1163 }
 0x2f9   : > { %v1166_v6 = vunpack.i.h.bf16 %v1164_v39  ;;  %v1165_v32 = vunpack.i.l.bf16 %v1164_v39 }
 0x2fb   : > { %v506_v7 = vpack.c.bf16 %v1166_v6, %v1165_v32 }
 0x2fc   : > { %v772_v8 = vpop.permute.xlu0 %771 }
 0x2fd   : > { %v780_v31 = vsel %vm510_vm3, %v772_v8, 0  ;;  %1106 = vmatmul.mubr.msk.bf16.vlgmr.msra.gmra.mxu1 %vm510_vm3, %v506_v7  ;;  %1128 = vmatprep.subr.msk.bf16.mxu1 %vm510_vm3, %v772_v8 }
 0x2fe   : > { %1116 = vmatpush3.bf16.xpose.msra.mxu1 %v780_v31 }
 0x304   : > { %v767_v9 = vpop.permute.xlu1 %766 }
 0x305   : > { %1117 = vmatprep.mubr.msk.bf16.mxu1 %vm510_vm3, %v767_v9 }
 0x35b   : > { %v769_v10 = vpop.permute.xlu0 %768 }
 0x35c   : > { %1118 = vmatmul.mubr.msk.bf16.vlgmr.msra.gmra.mxu1 %vm510_vm3, %v769_v10 }
 0x3bd   : > { %v1107_v11 = vpop.f32.mrf.mxu1 }
 0x3be   : > { %v563_v21 = vadd.f32 %v1107_v11, %v406_v12 }
 0x3bf   : > { %v554_v13 = vpop.f32.mrf.mxu1 }
 0x3c0   : > { %v555_v15 = vadd.f32 %v554_v13, %v406_v12  ;;  %v576_v24 = vsel %vm569_vm4, %v563_v21, -inf }
 0x3c1   : > { %v1108_v16 = vpop.f32.mrf.mxu1 }
 0x3c2   : > { %v566_v17 = vadd.f32 %v1108_v16, %v407_v14  ;;  %v570_v18 = vsel %vm569_vm4, %v555_v15, -inf }
 0x3c3   : > { %v557_v19 = vpop.f32.mrf.mxu1  ;;  %571 = vmax.xlane.f32.xlu1 %v570_v18 }
 0x3c4   : > { %v558_v20 = vadd.f32 %v557_v19, %v407_v14  ;;  %v579_v23 = vsel %vm569_vm4, %v566_v17, -inf }
 0x3c6   : > { %v573_v22 = vsel %vm569_vm4, %v558_v20, -inf }
 0x3c7   : > { %574 = vmax.xlane.f32.xlu0 %v573_v22  ;;  %580 = vmax.xlane.f32.xlu1 %v579_v23 }
 0x3cb   : > { %577 = vmax.xlane.f32.xlu0 %v576_v24 }
 0x41c   : > { %v1119_v25 = vpop.f32.mrf.mxu1 }
 0x41d   : > { %v825_v34 = vadd.f32 %v1119_v25, %v406_v12 }
 0x41e   : > { %v816_v27 = vpop.f32.mrf.mxu1 }
 0x41f   : > { %v817_v28 = vadd.f32 %v816_v27, %v406_v12  ;;  %v837_v40 = vsel %vm569_vm4, %v825_v34, -inf }
 0x420   : > { %v1120_v30 = vpop.f32.mrf.mxu1 }
 0x421   : > { %v831_v35 = vsel %vm569_vm4, %v817_v28, -inf  ;;  %v828_v38 = vadd.f32 %v1120_v30, %v407_v14 }
 0x422   : > { %v819_v36 = vpop.f32.mrf.mxu1  ;;  %832 = vmax.xlane.f32.xlu0 %v831_v35 }
 0x423   : > { %v820_v37 = vadd.f32 %v819_v36, %v407_v14  ;;  %v840_v42 = vsel %vm569_vm4, %v828_v38, -inf }
 0x425   : > { %v834_v41 = vsel %vm569_vm4, %v820_v37, -inf }
 0x426   : > { %838 = vmax.xlane.f32.xlu0 %v837_v40  ;;  %835 = vmax.xlane.f32.xlu1 %v834_v41 }
 0x42a   : > { %841 = vmax.xlane.f32.xlu1 %v840_v42 }
 0x44c   : > { %v572_v43 = vpop.xlane.xlu1 %571 }
 0x44d   : > { %v582_v49 = vsub.f32 %v555_v15, %v572_v43  ;;  %v448_v15 = vpack.c.bf16 %v1326_v29, %v1322_v26 }
 0x44f   : > { %v586_v55 = vmul.f32 1.442695, %v582_v49 }
 0x450   : > { %v575_v44 = vpop.xlane.xlu0 %574  ;;  %v581_v45 = vpop.xlane.xlu1 %580 }
 0x451   : > { %v583_v47 = vsub.f32 %v558_v20, %v575_v44  ;;  %v585_v48 = vsub.f32 %v566_v17, %v581_v45 }
 0x453   : > { %v592_v50 = vmul.f32 1.442695, %v585_v48  ;;  %v588_v51 = vmul.f32 1.442695, %v583_v47 }
 0x454   : > { %v578_v52 = vpop.xlane.xlu0 %577 }
 0x455   : > { %v584_v53 = vsub.f32 %v563_v21, %v578_v52  ;;  %1188 = vpow2.f32 %v592_v50 }
 0x456   : > { %1190 = vpow2.f32 %v588_v51 }
 0x457   : > { %v590_v56 = vmul.f32 1.442695, %v584_v53 }
 0x459   : > { %1192 = vpow2.f32 %v590_v56 }
 0x45a   : > { %1194 = vpow2.f32 %v586_v55 }
 0x462   : > { %v1189_v57 = vpop.eup %1188 }
 0x463   : > { %v603_v58 = vsel %vm569_vm4, %v1189_v57, 0.0  ;;  %v1191_v59 = vpop.eup %1190 }
 0x464   : > { %604 = vadd.xlane.f32.xlu1 %v603_v58  ;;  %v597_v63 = vsel %vm569_vm4, %v1191_v59, 0.0 }
 0x466   : > { %v1193_v60 = vpop.eup %1192 }
 0x467   : > { %v600_v61 = vsel %vm569_vm4, %v1193_v60, 0.0  ;;  %v1195_v62 = vpop.eup %1194 }
 0x468   : > { %601 = vadd.xlane.f32.xlu0 %v600_v61  ;;  %598 = vadd.xlane.f32.xlu1 %v597_v63  ;;  %v594_v0 = vsel %vm569_vm4, %v1195_v62, 0.0 }
 0x46c   : > { %595 = vadd.xlane.f32.xlu0 %v594_v0 }
 0x4ab   : > { %v833_v1 = vpop.xlane.xlu0 %832 }
 0x4ac   : > { %v843_v2 = vsub.f32 %v817_v28, %v833_v1 }
 0x4ae   : > { %v847_v5 = vmul.f32 1.442695, %v843_v2 }
 0x4af   : > { %v839_v3 = vpop.xlane.xlu0 %838  ;;  %v836_v4 = vpop.xlane.xlu1 %835 }
 0x4b0   : > { %v845_v46 = vsub.f32 %v825_v34, %v839_v3  ;;  %v844_v54 = vsub.f32 %v820_v37, %v836_v4 }
 0x4b2   : > { %v851_v33 = vmul.f32 1.442695, %v845_v46  ;;  %v849_v32 = vmul.f32 1.442695, %v844_v54 }
 0x4b3   : > { %v842_v39 = vpop.xlane.xlu1 %841 }
 0x4b4   : > { %1196 = vpow2.f32 %v851_v33  ;;  %v846_v6 = vsub.f32 %v828_v38, %v842_v39 }
 0x4b5   : > { %1198 = vpow2.f32 %v847_v5 }
 0x4b6   : > { %v853_v7 = vmul.f32 1.442695, %v846_v6 }
 0x4b8   : > { %1200 = vpow2.f32 %v853_v7 }
 0x4b9   : > { %1202 = vpow2.f32 %v849_v32 }
 0x4c1   : > { %v1197_v8 = vpop.eup %1196 }
 0x4c2   : > { %v861_v31 = vsel %vm569_vm4, %v1197_v8, 0.0  ;;  %v1199_v9 = vpop.eup %1198 }
 0x4c3   : > { %862 = vadd.xlane.f32.xlu0 %v861_v31  ;;  %v855_v11 = vsel %vm569_vm4, %v1199_v9, 0.0 }
 0x4c5   : > { %v1201_v10 = vpop.eup %1200 }
 0x4c6   : > { %v864_v12 = vsel %vm569_vm4, %v1201_v10, 0.0  ;;  %v1203_v13 = vpop.eup %1202 }
 0x4c7   : > { %856 = vadd.xlane.f32.xlu0 %v855_v11  ;;  %865 = vadd.xlane.f32.xlu1 %v864_v12  ;;  %v858_v14 = vsel %vm569_vm4, %v1203_v13, 0.0 }
 0x4cb   : > { %859 = vadd.xlane.f32.xlu1 %v858_v14 }
 0x4dc   : > { %877 = vrot.lane.b32.xlu1 %v448_v15, %s1246_s25 }
 0x4dd   : > { %617 = vrot.lane.b32.xlu0 %v448_v15, %s1247_s30 }
 0x4ed   : > { %v605_v16 = vpop.xlane.xlu1 %604 }
 0x4ee   : > { %1204 = vrcp.f32 %v605_v16 }
 0x4f1   : > { %v602_v17 = vpop.xlane.xlu0 %601  ;;  %v599_v18 = vpop.xlane.xlu1 %598 }
 0x4f2   : > { %1206 = vrcp.f32 %v602_v17 }
 0x4f3   : > { %1208 = vrcp.f32 %v599_v18 }
 0x4f5   : > { %v596_v19 = vpop.xlane.xlu0 %595 }
 0x4f6   : > { %1210 = vrcp.f32 %v596_v19 }
 0x4fb   : > { %v1205_v20 = vpop.eup %1204 }
 0x4fc   : > { %v613_v23 = vmul.f32 %v1205_v20, %v1189_v57 }
 0x4ff   : > { %v1207_v21 = vpop.eup %1206 }
 0x500   : > { %v612_v22 = vmul.f32 %v1207_v21, %v1193_v60  ;;  %v1209_v24 = vpop.eup %1208 }
 0x501   : > { %v611_v29 = vmul.f32 %v1209_v24, %v1191_v59 }
 0x502   : > { %v615_v25 = vpack.c.bf16 %v613_v23, %v612_v22 }
 0x503   : > { %v1211_v27 = vpop.eup %1210 }
 0x504   : > { %v610_v26 = vmul.f32 %v1211_v27, %v1195_v62 }
 0x506   : > { %v614_v28 = vpack.c.bf16 %v611_v29, %v610_v26 }
 0x508   : > { %1111 = vmatprep.mubr.msk.bf16.mxu0 %vm569_vm4, %v614_v28 }
 0x54c   : > { %v863_v30 = vpop.xlane.xlu0 %862 }
 0x550   : > { %v857_v34 = vpop.xlane.xlu0 %856  ;;  %v866_v35 = vpop.xlane.xlu1 %865 }
 0x551   : > { %1212 = vrcp.f32 %v866_v35 }
 0x552   : > { %1214 = vrcp.f32 %v857_v34 }
 0x553   : > { %1216 = vrcp.f32 %v863_v30 }
 0x554   : > { %v860_v36 = vpop.xlane.xlu1 %859  ;;  %v618_v37 = vpop.permute.xlu0 %617 }
 0x555   : > { %1218 = vrcp.f32 %v860_v36  ;;  %1109 = vmatprep.subr.bf16.mxu0 %v618_v37 }
 0x556   : > { %1110 = vmatpush3.bf16.msra.mxu0 %v618_v37 }
 0x558   : > { %v878_v38 = vpop.permute.xlu1 %877 }
 0x559   : > { %1112 = vmatmul.mubr.msk.bf16.vlgmr.msra.gmra.mxu0 %vm569_vm4, %v615_v25  ;;  %1121 = vmatprep.subr.bf16.mxu0 %v878_v38 }
 0x55a   : > { %1122 = vmatpush3.bf16.msra.mxu0 %v878_v38 }
 0x55e   : > { %v1213_v40 = vpop.eup %1212 }
 0x55f   : > { %v1215_v41 = vpop.eup %1214  ;;  %v874_v44 = vmul.f32 %v1213_v40, %v1201_v10 }
 0x560   : > { %v1217_v42 = vpop.eup %1216  ;;  %v871_v45 = vmul.f32 %v1215_v41, %v1199_v9 }
 0x561   : > { %v873_v48 = vmul.f32 %v1217_v42, %v1197_v8 }
 0x562   : > { %v1219_v43 = vpop.eup %1218 }
 0x563   : > { %v872_v47 = vmul.f32 %v1219_v43, %v1203_v13  ;;  %v876_v50 = vpack.c.bf16 %v874_v44, %v873_v48 }
 0x565   : > { %v875_v49 = vpack.c.bf16 %v872_v47, %v871_v45 }
 0x567   : > { %1123 = vmatprep.mubr.msk.bf16.mxu0 %vm569_vm4, %v875_v49 }
 0x568   : > { %1124 = vmatmul.mubr.msk.bf16.vlgmr.msra.gmra.mxu0 %vm569_vm4, %v876_v50 }
 0x619   : > { %v1113_v51 = vpop.f32.mrf.mxu0 }
 0x61b   : > { %v660_v52 = vpop.f32.mrf.mxu0 }
 0x61d   : > { %v1114_v53 = vpop.f32.mrf.mxu0 }
 0x61e   : > { %v1167_v55 = vpack.i.bf16 %v1114_v53, %v1113_v51 }
 0x61f   : > { %v663_v56 = vpop.f32.mrf.mxu0 }
 0x620   : > { %1168 = vrot.lane.b32.xlu1 %v1167_v55, %s1238_s13 }
 0x628   : > { %v1125_v57 = vpop.f32.mrf.mxu0 }
 0x62a   : > { %v920_v58 = vpop.f32.mrf.mxu0 }
 0x62c   : > { %v1126_v59 = vpop.f32.mrf.mxu0 }
 0x62d   : > { %v1177_v60 = vpack.i.bf16 %v1126_v59, %v1125_v57 }
 0x62e   : > { %v923_v61 = vpop.f32.mrf.mxu0 }
 0x62f   : > { %v1172_v62 = vpack.i.bf16 %v923_v61, %v920_v58  ;;  %1178 = vrot.lane.b32.xlu1 %v1177_v60, %s1234_s22 }
 0x631   : > { %1173 = vrot.lane.b32.xlu0 %v1172_v62, %s1240_s15 }
 0x692   : > { %v1169_v63 = vpop.permute.xlu1 %1168 }
 0x693   : > { %v1171_v0 = vunpack.i.h.bf16 %v1169_v63  ;;  %v1170_v1 = vunpack.i.l.bf16 %v1169_v63 }
 0x695   : > { %v959_v5 = vsel %vm510_vm3, %v660_v52, %v1170_v1  ;;  %v960_v33 = vsel %vm510_vm3, %v663_v56, %v1171_v0 }
 0x6a1   : > { %v1179_v2 = vpop.permute.xlu1 %1178 }
 0x6a2   : > { %v1181_v54 = vunpack.i.h.bf16 %v1179_v2  ;;  %v1180_v39 = vunpack.i.l.bf16 %v1179_v2 }
 0x6a3   : > { %v1174_v3 = vpop.permute.xlu0 %1173 }
 0x6a4   : > { %v1176_v4 = vunpack.i.h.bf16 %v1174_v3  ;;  %v1175_v46 = vunpack.i.l.bf16 %v1174_v3 }
 0x6a6   : > { %v962_v6 = vsel %vm569_vm4, %v960_v33, %v1176_v4  ;;  %v961_v32 = vsel %vm569_vm4, %v959_v5, %v1175_v46 }
 0x6a7   : > { %v965_v7 = vsel %vm963_vm5, %v962_v6, %v1181_v54  ;;  %v964_v8 = vsel %vm963_vm5, %v961_v32, %v1180_v39 }
 0x6a8   : > { %v1075_v31 = vpack.c.bf16 %v965_v7, %v965_v7  ;;  %v1074_v9 = vpack.c.bf16 %v964_v8, %v964_v8 }
 0x6aa   : > { %975 = vst.msk [vmem:[%s300_s9] sm:$0xf] %vm974_vm6, %v1074_v9  ;;  %976 = vst.msk [vmem:[%s300_s9 + $0x4] sm:$0xf] %vm974_vm6, %v1075_v31 }
 0x6ab PF: > { %s17_s24 = sadd.s32 1, %s1226_s24  }
 0x6ac   : > { %p14_p5 = scmp.ge.s32.totalorder %s17_s24, 4  }
 0x6ae   :  { %16 = sbr.rel (!%p14_p5) target bundleno = 1 (0x1), region = 81 }

</bundles_post_ra>
